<compile_context>
chip_gen: v5e
topology: v5e:2x2
jax: 0.10.0
libtpu: 0.0.40
codegen_flags: <defaults>
</compile_context>

<pallas_src>
import jax
import jax.numpy as jnp
from jax.experimental import pallas as pl
from jax.experimental.pallas import tpu as pltpu

EPS = 1e-5  # nn.BatchNorm1d default eps

D_IN, H1, H2 = 128, 1024, 256

# Packed per-feature parameter row layout (all offsets are multiples of 128,
# so every slice is lane-aligned).
Q1_OFF = 0                    # (1, H1) dequant scale for w1
G1_OFF = Q1_OFF + H1          # (1, H1) BN1 gamma
BE1_OFF = G1_OFF + H1         # (1, H1) BN1 beta
Q2_OFF = BE1_OFF + H1         # (1, H2) dequant scale for w2
G2_OFF = Q2_OFF + H2          # (1, H2) BN2 gamma
BE2_OFF = G2_OFF + H2         # (1, H2) BN2 beta
W3_OFF = BE2_OFF + H2         # (1, H2) final linear weight row
B3_OFF = W3_OFF + H2          # (1, 1)  final linear bias (rest of 128 lanes pad)
P_LEN = B3_OFF + 128          # 4224 = 33 * 128


def domain_clf_kernel(x_ref, w1_ref, w2_ref, p_ref, o_ref):
    # GRF.forward is identity -> nothing to do.
    x = x_ref[...]                                     # (B, 128) bf16
    inv_b = 1.0 / x.shape[0]

    # Single packed parameter row; static slices of the ref are cheap.
    q1 = p_ref[:, Q1_OFF:Q1_OFF + H1]
    g1 = p_ref[:, G1_OFF:G1_OFF + H1]
    be1 = p_ref[:, BE1_OFF:BE1_OFF + H1]
    q2 = p_ref[:, Q2_OFF:Q2_OFF + H2]
    g2 = p_ref[:, G2_OFF:G2_OFF + H2]
    be2 = p_ref[:, BE2_OFF:BE2_OFF + H2]
    w3 = p_ref[:, W3_OFF:W3_OFF + H2]
    b3 = p_ref[:, B3_OFF:B3_OFF + 1]                   # (1, 1)

    # ---- Linear(128 -> 1024), int8 weights (bias cancelled by BN mean-sub) --
    # int8 -> f32 -> bf16 is exact for |w| <= 127; MXU accumulates in f32.
    w1 = w1_ref[...].astype(jnp.float32).astype(jnp.bfloat16)
    h = jnp.dot(x, w1, preferred_element_type=jnp.float32)        # (B, H1) raw

    # ---- BatchNorm1d(H1), train-mode stats, dequant scale folded in --------
    mu_r = jnp.sum(h, axis=0, keepdims=True) * inv_b               # raw mean
    ex2_r = jnp.sum(h * h, axis=0, keepdims=True) * inv_b          # raw E[h^2]
    mu = mu_r * q1                                                 # mean of q*h
    var = jnp.maximum(ex2_r * (q1 * q1) - mu * mu, 0.0)            # clamp f32 cancellation
    s = g1 * jax.lax.rsqrt(var + EPS)
    h = jnp.maximum(h * (s * q1) + (be1 - mu * s), 0.0)            # BN + ReLU

    # ---- Linear(1024 -> 256), int8 weights ---------------------------------
    w2 = w2_ref[...].astype(jnp.float32).astype(jnp.bfloat16)
    h = jnp.dot(h.astype(jnp.bfloat16), w2,
                preferred_element_type=jnp.float32)                # (B, H2) raw

    # ---- BatchNorm1d(H2) + ReLU, dequant scale folded in -------------------
    mu_r = jnp.sum(h, axis=0, keepdims=True) * inv_b
    ex2_r = jnp.sum(h * h, axis=0, keepdims=True) * inv_b
    mu = mu_r * q2
    var = jnp.maximum(ex2_r * (q2 * q2) - mu * mu, 0.0)
    s = g2 * jax.lax.rsqrt(var + EPS)
    h = jnp.maximum(h * (s * q2) + (be2 - mu * s), 0.0)

    # ---- Linear(256 -> 1): VPU multiply + lane reduce against (1,256) row --
    o_ref[...] = jnp.sum(h * w3, axis=-1, keepdims=True) + b3


def quantize_per_channel_i8(w):
    """Symmetric per-output-channel int8 quantization. w: (in, out)."""
    amax = jnp.max(jnp.abs(w), axis=0, keepdims=True)
    q = jnp.maximum(amax, 1e-30) / 127.0                           # (1, out)
    w_i8 = jnp.clip(jnp.round(w / q), -127.0, 127.0).astype(jnp.int8)
    return w_i8, q


def pack_params(params):
    """One-time prep: quantize w1/w2 to int8, drop the pre-BN biases
    (exactly cancelled by train-mode BN), and pack every small per-feature
    vector into a single lane-aligned f32 row."""
    (w1, b1, g1, be1, w2, b2, g2, be2, w3, b3) = params
    del b1, b2  # cancelled by the BN mean subtraction (train-mode stats)

    w1_i8, q1 = quantize_per_channel_i8(w1)
    w2_i8, q2 = quantize_per_channel_i8(w2)

    pvec = jnp.zeros((1, P_LEN), jnp.float32)
    pvec = pvec.at[:, Q1_OFF:Q1_OFF + H1].set(q1)
    pvec = pvec.at[:, G1_OFF:G1_OFF + H1].set(g1.reshape(1, H1))
    pvec = pvec.at[:, BE1_OFF:BE1_OFF + H1].set(be1.reshape(1, H1))
    pvec = pvec.at[:, Q2_OFF:Q2_OFF + H2].set(q2)
    pvec = pvec.at[:, G2_OFF:G2_OFF + H2].set(g2.reshape(1, H2))
    pvec = pvec.at[:, BE2_OFF:BE2_OFF + H2].set(be2.reshape(1, H2))
    pvec = pvec.at[:, W3_OFF:W3_OFF + H2].set(w3.reshape(1, H2))
    pvec = pvec.at[:, B3_OFF:B3_OFF + 1].set(b3.reshape(1, 1))
    return (w1_i8, w2_i8, pvec)


def domain_classifier_forward(x, packed_params, lambda_=1.0):
    """Forward pass. `lambda_` only affects the backward pass (GRF) in the
    PyTorch module, so it is accepted and ignored here."""
    del lambda_
    w1_i8, w2_i8, pvec = packed_params
    B = x.shape[0]
    x = x.astype(jnp.bfloat16)  # half-width x DMA; matmul compute is bf16 anyway

    args = (x, w1_i8, w2_i8, pvec)

    def full_spec(shape):
        return pl.BlockSpec(shape, lambda: (0,) * len(shape))

    flops = int(2 * B * (D_IN * H1 + H1 * H2)        # the two MXU matmuls
                + 2 * B * H2                          # final dot-row reduce
                + 10 * B * (H1 + H2))                 # BN + ReLU elementwise
    bytes_accessed = int(x.size * 2 + w1_i8.size + w2_i8.size
                         + pvec.size * 4 + B * 4)

    # Explicit scoped-VMEM budget: double-buffered input blocks, in-kernel
    # dequant temps (f32 + bf16 copies of w1/w2), activation temps, + slack.
    vmem_limit = int(2 * (x.size * 2 + w1_i8.size + w2_i8.size + pvec.size * 4 + B * 512)
                     + 6 * (w1_i8.size + w2_i8.size)
                     + 20 * 1024 * B
                     + (8 << 20))
    vmem_limit = min(max(vmem_limit, 16 << 20), 64 << 20)

    return pl.pallas_call(
        domain_clf_kernel,
        out_shape=jax.ShapeDtypeStruct((B, 1), jnp.float32),
        in_specs=[full_spec(a.shape) for a in args],
        out_specs=full_spec((B, 1)),
        compiler_params=pltpu.CompilerParams(vmem_limit_bytes=vmem_limit),
        cost_estimate=pl.CostEstimate(
            flops=flops,
            transcendentals=H1 + H2,                  # the two rsqrt rows
            bytes_accessed=bytes_accessed),
    )(*args)


def init_params(key):
    """Deterministic synthetic parameters matching the module's shapes
    (Linear weights stored as (in, out), f32 like the PyTorch module)."""
    ks = jax.random.split(key, 6)
    w1 = jax.random.normal(ks[0], (D_IN, H1), jnp.float32) * 0.05
    b1 = jax.random.normal(ks[1], (1, H1), jnp.float32) * 0.05     # dropped by kernel
    g1 = jnp.ones((1, H1), jnp.float32)     # BatchNorm1d weight (gamma)
    be1 = jnp.zeros((1, H1), jnp.float32)   # BatchNorm1d bias (beta)

    w2 = jax.random.normal(ks[2], (H1, H2), jnp.float32) * 0.03
    b2 = jax.random.normal(ks[3], (1, H2), jnp.float32) * 0.03     # dropped by kernel
    g2 = jnp.ones((1, H2), jnp.float32)
    be2 = jnp.zeros((1, H2), jnp.float32)

    w3 = jax.random.normal(ks[4], (H2, 1), jnp.float32) * 0.05
    b3 = jax.random.normal(ks[5], (1, 1), jnp.float32) * 0.05
    return (w1, b1, g1, be1, w2, b2, g2, be2, w3, b3)


def reference_forward(x, packed_params, b1, b2):
    """Pure-JAX reference mirroring PyTorch semantics (pre-BN biases INCLUDED,
    two-pass variance, dequant scale applied right after the matmul) on the
    SAME int8-quantized weights — validates the kernel's bias-drop / BN-fold /
    one-pass-stats rewrites, not int8-vs-f32 fidelity of the original net."""
    w1_i8, w2_i8, p = packed_params
    q1 = p[:, Q1_OFF:Q1_OFF + H1]
    g1 = p[:, G1_OFF:G1_OFF + H1]
    be1 = p[:, BE1_OFF:BE1_OFF + H1]
    q2 = p[:, Q2_OFF:Q2_OFF + H2]
    g2 = p[:, G2_OFF:G2_OFF + H2]
    be2 = p[:, BE2_OFF:BE2_OFF + H2]
    w3 = p[:, W3_OFF:W3_OFF + H2].reshape(H2, 1)
    b3 = p[:, B3_OFF:B3_OFF + 1]

    def bn(h, g, be):
        mu = jnp.mean(h, axis=0, keepdims=True)
        var = jnp.mean((h - mu) ** 2, axis=0, keepdims=True)
        return (h - mu) / jnp.sqrt(var + EPS) * g + be

    w1 = w1_i8.astype(jnp.float32).astype(jnp.bfloat16)
    w2 = w2_i8.astype(jnp.float32).astype(jnp.bfloat16)

    h = jnp.dot(x.astype(jnp.bfloat16), w1, preferred_element_type=jnp.float32) * q1 + b1
    h = jnp.maximum(bn(h, g1, be1), 0.0)
    h = jnp.dot(h.astype(jnp.bfloat16), w2, preferred_element_type=jnp.float32) * q2 + b2
    h = jnp.maximum(bn(h, g2, be2), 0.0)
    return jnp.dot(h, w3) + b3


if __name__ == "__main__":
    key = jax.random.PRNGKey(0)
    k_x, k_p = jax.random.split(key)

    B = 8
    x = jax.random.normal(k_x, (B, D_IN), jnp.float32)
    params = init_params(k_p)
    packed = pack_params(params)          # one-time quantize + pack

    out = domain_classifier_forward(x, packed, lambda_=0.5)
    out = jax.block_until_ready(out)

    ref = reference_forward(x, packed, params[1], params[5])
    assert out.shape == (B, 1), out.shape
    assert jnp.allclose(out, ref, atol=1e-2, rtol=1e-2), (out, ref)

    print("KERNEL_OK")
</pallas_src>

<mosaic_0001>
module attributes {stable_mosaic.version = 11 : i64} {
  func.func @domain_clf_kernel(%arg0: memref<8x128xbf16, #tpu.memory_space<vmem>>, %arg1: memref<128x1024xi8, #tpu.memory_space<vmem>>, %arg2: memref<1024x256xi8, #tpu.memory_space<vmem>>, %arg3: memref<1x4224xf32, #tpu.memory_space<vmem>>, %arg4: memref<8x1xf32, #tpu.memory_space<vmem>>) attributes {dimension_semantics = [], scalar_prefetch = 0 : i64, scratch_operands = 0 : i64, tpu.core_type = #tpu.core_type<tc>} {
    %c0 = arith.constant 0 : index
    %c0_0 = arith.constant 0 : index
    %0 = vector.load %arg0[%c0, %c0_0] : memref<8x128xbf16, #tpu.memory_space<vmem>>, vector<8x128xbf16>
    %c0_1 = arith.constant 0 : index
    %c0_2 = arith.constant 0 : index
    %1 = vector.load %arg3[%c0_1, %c0_2] : memref<1x4224xf32, #tpu.memory_space<vmem>>, vector<1x1024xf32>
    %c0_3 = arith.constant 0 : index
    %c1024 = arith.constant 1024 : index
    %2 = vector.load %arg3[%c0_3, %c1024] : memref<1x4224xf32, #tpu.memory_space<vmem>>, vector<1x1024xf32>
    %c0_4 = arith.constant 0 : index
    %c2048 = arith.constant 2048 : index
    %3 = vector.load %arg3[%c0_4, %c2048] : memref<1x4224xf32, #tpu.memory_space<vmem>>, vector<1x1024xf32>
    %c0_5 = arith.constant 0 : index
    %c3072 = arith.constant 3072 : index
    %4 = vector.load %arg3[%c0_5, %c3072] : memref<1x4224xf32, #tpu.memory_space<vmem>>, vector<1x256xf32>
    %c0_6 = arith.constant 0 : index
    %c3328 = arith.constant 3328 : index
    %5 = vector.load %arg3[%c0_6, %c3328] : memref<1x4224xf32, #tpu.memory_space<vmem>>, vector<1x256xf32>
    %c0_7 = arith.constant 0 : index
    %c3584 = arith.constant 3584 : index
    %6 = vector.load %arg3[%c0_7, %c3584] : memref<1x4224xf32, #tpu.memory_space<vmem>>, vector<1x256xf32>
    %c0_8 = arith.constant 0 : index
    %c3840 = arith.constant 3840 : index
    %7 = vector.load %arg3[%c0_8, %c3840] : memref<1x4224xf32, #tpu.memory_space<vmem>>, vector<1x256xf32>
    %c0_9 = arith.constant 0 : index
    %c4096 = arith.constant 4096 : index
    %8 = vector.load %arg3[%c0_9, %c4096] : memref<1x4224xf32, #tpu.memory_space<vmem>>, vector<1x1xf32>
    %c0_10 = arith.constant 0 : index
    %c0_11 = arith.constant 0 : index
    %9 = vector.load %arg1[%c0_10, %c0_11] : memref<128x1024xi8, #tpu.memory_space<vmem>>, vector<128x1024xi8>
    %10 = arith.sitofp %9 : vector<128x1024xi8> to vector<128x1024xf32>
    %11 = arith.truncf %10 : vector<128x1024xf32> to vector<128x1024xbf16>
    %cst = arith.constant dense<0.000000e+00> : vector<8x1024xf32>
    %12 = tpu.matmul %0, %11, %cst {dimension_numbers = #tpu.dot_dimension_numbers<[1], [0], [0], [1], [0, 0, 1, 1], [], []>} : vector<8x128xbf16>, vector<128x1024xbf16>, vector<8x1024xf32> -> vector<8x1024xf32>
    %cst_12 = arith.constant dense<0.000000e+00> : vector<1024xf32>
    %13 = vector.multi_reduction <add>, %12, %cst_12 [0] : vector<8x1024xf32> to vector<1024xf32>
    %14 = vector.shape_cast %13 : vector<1024xf32> to vector<1x1024xf32>
    %cst_13 = arith.constant 1.250000e-01 : f32
    %15 = vector.broadcast %cst_13 : f32 to vector<1x1024xf32>
    %16 = arith.mulf %14, %15 : vector<1x1024xf32>
    %17 = arith.mulf %12, %12 : vector<8x1024xf32>
    %cst_14 = arith.constant dense<0.000000e+00> : vector<1024xf32>
    %18 = vector.multi_reduction <add>, %17, %cst_14 [0] : vector<8x1024xf32> to vector<1024xf32>
    %19 = vector.shape_cast %18 : vector<1024xf32> to vector<1x1024xf32>
    %cst_15 = arith.constant 1.250000e-01 : f32
    %20 = vector.broadcast %cst_15 : f32 to vector<1x1024xf32>
    %21 = arith.mulf %19, %20 : vector<1x1024xf32>
    %22 = arith.mulf %16, %1 : vector<1x1024xf32>
    %23 = arith.mulf %1, %1 : vector<1x1024xf32>
    %24 = arith.mulf %21, %23 : vector<1x1024xf32>
    %25 = arith.mulf %22, %22 : vector<1x1024xf32>
    %26 = arith.subf %24, %25 : vector<1x1024xf32>
    %cst_16 = arith.constant 0.000000e+00 : f32
    %27 = vector.broadcast %cst_16 : f32 to vector<1x1024xf32>
    %28 = arith.maximumf %26, %27 : vector<1x1024xf32>
    %cst_17 = arith.constant 9.99999974E-6 : f32
    %29 = vector.broadcast %cst_17 : f32 to vector<1x1024xf32>
    %30 = arith.addf %28, %29 : vector<1x1024xf32>
    %31 = math.rsqrt %30 : vector<1x1024xf32>
    %32 = arith.mulf %2, %31 : vector<1x1024xf32>
    %33 = arith.mulf %32, %1 : vector<1x1024xf32>
    %34 = vector.broadcast %33 : vector<1x1024xf32> to vector<8x1024xf32>
    %35 = arith.mulf %12, %34 : vector<8x1024xf32>
    %36 = arith.mulf %22, %32 : vector<1x1024xf32>
    %37 = arith.subf %3, %36 : vector<1x1024xf32>
    %38 = vector.broadcast %37 : vector<1x1024xf32> to vector<8x1024xf32>
    %39 = arith.addf %35, %38 : vector<8x1024xf32>
    %cst_18 = arith.constant 0.000000e+00 : f32
    %40 = vector.broadcast %cst_18 : f32 to vector<8x1024xf32>
    %41 = arith.maximumf %39, %40 : vector<8x1024xf32>
    %c0_19 = arith.constant 0 : index
    %c0_20 = arith.constant 0 : index
    %42 = vector.load %arg2[%c0_19, %c0_20] : memref<1024x256xi8, #tpu.memory_space<vmem>>, vector<1024x256xi8>
    %43 = arith.sitofp %42 : vector<1024x256xi8> to vector<1024x256xf32>
    %44 = arith.truncf %43 : vector<1024x256xf32> to vector<1024x256xbf16>
    %45 = arith.truncf %41 : vector<8x1024xf32> to vector<8x1024xbf16>
    %cst_21 = arith.constant dense<0.000000e+00> : vector<8x256xf32>
    %46 = tpu.matmul %45, %44, %cst_21 {dimension_numbers = #tpu.dot_dimension_numbers<[1], [0], [0], [1], [0, 0, 1, 1], [], []>} : vector<8x1024xbf16>, vector<1024x256xbf16>, vector<8x256xf32> -> vector<8x256xf32>
    %cst_22 = arith.constant dense<0.000000e+00> : vector<256xf32>
    %47 = vector.multi_reduction <add>, %46, %cst_22 [0] : vector<8x256xf32> to vector<256xf32>
    %48 = vector.shape_cast %47 : vector<256xf32> to vector<1x256xf32>
    %cst_23 = arith.constant 1.250000e-01 : f32
    %49 = vector.broadcast %cst_23 : f32 to vector<1x256xf32>
    %50 = arith.mulf %48, %49 : vector<1x256xf32>
    %51 = arith.mulf %46, %46 : vector<8x256xf32>
    %cst_24 = arith.constant dense<0.000000e+00> : vector<256xf32>
    %52 = vector.multi_reduction <add>, %51, %cst_24 [0] : vector<8x256xf32> to vector<256xf32>
    %53 = vector.shape_cast %52 : vector<256xf32> to vector<1x256xf32>
    %cst_25 = arith.constant 1.250000e-01 : f32
    %54 = vector.broadcast %cst_25 : f32 to vector<1x256xf32>
    %55 = arith.mulf %53, %54 : vector<1x256xf32>
    %56 = arith.mulf %50, %4 : vector<1x256xf32>
    %57 = arith.mulf %4, %4 : vector<1x256xf32>
    %58 = arith.mulf %55, %57 : vector<1x256xf32>
    %59 = arith.mulf %56, %56 : vector<1x256xf32>
    %60 = arith.subf %58, %59 : vector<1x256xf32>
    %cst_26 = arith.constant 0.000000e+00 : f32
    %61 = vector.broadcast %cst_26 : f32 to vector<1x256xf32>
    %62 = arith.maximumf %60, %61 : vector<1x256xf32>
    %cst_27 = arith.constant 9.99999974E-6 : f32
    %63 = vector.broadcast %cst_27 : f32 to vector<1x256xf32>
    %64 = arith.addf %62, %63 : vector<1x256xf32>
    %65 = math.rsqrt %64 : vector<1x256xf32>
    %66 = arith.mulf %5, %65 : vector<1x256xf32>
    %67 = arith.mulf %66, %4 : vector<1x256xf32>
    %68 = vector.broadcast %67 : vector<1x256xf32> to vector<8x256xf32>
    %69 = arith.mulf %46, %68 : vector<8x256xf32>
    %70 = arith.mulf %56, %66 : vector<1x256xf32>
    %71 = arith.subf %6, %70 : vector<1x256xf32>
    %72 = vector.broadcast %71 : vector<1x256xf32> to vector<8x256xf32>
    %73 = arith.addf %69, %72 : vector<8x256xf32>
    %cst_28 = arith.constant 0.000000e+00 : f32
    %74 = vector.broadcast %cst_28 : f32 to vector<8x256xf32>
    %75 = arith.maximumf %73, %74 : vector<8x256xf32>
    %76 = vector.broadcast %7 : vector<1x256xf32> to vector<8x256xf32>
    %77 = arith.mulf %75, %76 : vector<8x256xf32>
    %cst_29 = arith.constant dense<0.000000e+00> : vector<8xf32>
    %78 = vector.multi_reduction <add>, %77, %cst_29 [1] : vector<8x256xf32> to vector<8xf32>
    %79 = vector.shape_cast %78 : vector<8xf32> to vector<8x1xf32>
    %80 = vector.broadcast %8 : vector<1x1xf32> to vector<8x1xf32>
    %81 = arith.addf %79, %80 : vector<8x1xf32>
    %c0_30 = arith.constant 0 : index
    %c0_31 = arith.constant 0 : index
    %82 = vector.load %arg4[%c0_30, %c0_31] : memref<8x1xf32, #tpu.memory_space<vmem>>, vector<8x1xf32>
    tpu.vector_store %arg4[%c0_30, %c0_31], %81 {strides = array<i32>} : memref<8x1xf32, #tpu.memory_space<vmem>>, vector<8x1xf32>,
    return
  }
}

</mosaic_0001>

<bundles_post_ra>
// kernel: tpu_custom_call.1
= control target key start
LH: loop header
LB: loop body
LE: loop exit
PB: predicated region body
PF: predicated region fallthrough
CT: control target
= control target key end

     0   :  { %9 = vsyncpa [#allocation3], 0  ;;  %s2648_s0 = inlined_call_operand.hbm [shape: bf16[8,128], index: 0, kind: input, shape index: {}]   ;;  %s2649_s1 = inlined_call_operand.hbm [shape: s8[128,1024], index: 1, kind: input, shape index: {}]   ;;  %s2650_s2 = inlined_call_operand.hbm [shape: s8[1024,256], index: 2, kind: input, shape index: {}]   ;;  %s2651_s3 = inlined_call_operand.hbm [shape: f32[1,4224], index: 3, kind: input, shape index: {}]   ;;  %s2652_s4 = inlined_call_operand.vmem [shape: f32[8,1], index: 4, kind: output, shape index: {}]  }
   0x1   :  { %10 = vsyncpa [#allocation5], 0  ;;  %s27_s17 = sshll.u32 %s2649_s1, 4  ;;  %s28_s17 = int_to_ptr.hbm [resolvable:$true] %s27_s17 }
   0x2   :  { %11 = vsyncpa [#allocation8], 0  ;;  %s2146_s18 = smov [#allocation4]   ;;  %s17_s22 = sshll.u32 %s2648_s0, 4  ;;  %s18_s22 = int_to_ptr.hbm [resolvable:$true] %s17_s22 }
   0x3   :  { %s29_s19 = sshll.u32 %s2146_s18, 4  ;;  %s2147_s23 = smov 1024   ;;  %s30_s19 = int_to_ptr.vmem [resolvable:$true] %s29_s19 }
   0x4   :  { %s2148_s24 = smov 64   ;;  %s2149_s25 = smov [#allocation2]  }
   0x5   :  { %35 = dma.hbm_to_vmem [thread:$0]  %s28_s17, 4096, %s30_s19, [#allocation5], %s2147_s23, %s2147_s23, %s2148_s24  }
   0x6   :  { %s19_s26 = sshll.u32 %s2149_s25, 4  ;;  %s40_s29 = sshll.u32 %s2650_s2, 4  ;;  %s20_s26 = int_to_ptr.vmem [resolvable:$true] %s19_s26  ;;  %s41_s29 = int_to_ptr.hbm [resolvable:$true] %s40_s29 }
   0x7   :  { %22 = dma.hbm_to_vmem [thread:$0]  %s18_s22, 64, %s20_s26, [#allocation3]  }
   0x8   :  { %s2150_s1 = smov [#allocation6]   ;;  %s54_s0 = sshll.u32 %s2651_s3, 4  ;;  %s55_s0 = int_to_ptr.hbm [resolvable:$true] %s54_s0 }
   0x9   :  { %s42_s30 = sshll.u32 %s2150_s1, 4  ;;  %s2151_s7 = smov 256   ;;  %s43_s30 = int_to_ptr.vmem [resolvable:$true] %s42_s30 }
   0xa   :  { %s2152_s8 = smov 16   ;;  %s2153_s9 = smov [#allocation7]  }
   0xb   :  { %48 = dma.hbm_to_vmem [thread:$0]  %s41_s29, 8192, %s43_s30, [#allocation5], %s2151_s7, %s2151_s7, %s2152_s8  }
   0xc   :  { %s56_s10 = sshll.u32 %s2153_s9, 4  ;;  %s57_s10 = int_to_ptr.vmem [resolvable:$true] %s56_s10 }
   0xd   :  { %59 = dma.hbm_to_vmem [thread:$0]  %s55_s0, 528, %s57_s10, [#allocation8]  }
   0xe   :  { %2140 = dma.done.wait [#allocation3], 64  }
   0xf   :  { %2141 = vsyncadd [#allocation3], 4294967232 }
  0x10   :  { %2142 = dma.done.wait [#allocation5], 12288  }
  0x11   :  { %2143 = vsyncadd [#allocation5], 4294955008 }
  0x12   :  { %2144 = dma.done.wait [#allocation8], 528  }
  0x13   :  { %2145 = vsyncadd [#allocation8], 4294966768  ;;  %v109_v0 = vld [vmem:[#allocation4 + $0xc0] sm:$0xff]  ;;  %v110_v1 = vld [vmem:[#allocation4 + $0xc8] sm:$0xff]  ;;  %vm841_vm10 = vcmask 1042434   ;;  %vm839_vm11 = vcmask 1040384  }
  0x14   :  { %v111_v2 = vld [vmem:[#allocation4 + $0xd0] sm:$0xff]  ;;  %v229_v3 = vunpack.c.2.s8 %v109_v0  ;;  %v237_v4 = vunpack.c.3.s8 %v109_v0  ;;  %v230_v5 = vunpack.c.2.s8 %v110_v1  ;;  %v238_v6 = vunpack.c.3.s8 %v110_v1  ;;  %v112_v7 = vld [vmem:[#allocation4 + $0xd8] sm:$0xff]  ;;  %v101_v28 = vld [vmem:[#allocation4 + $0x80] sm:$0xff] }
  0x15   :  { %v231_v8 = vunpack.c.2.s8 %v111_v2  ;;  %v239_v9 = vunpack.c.3.s8 %v111_v2  ;;  %v232_v10 = vunpack.c.2.s8 %v112_v7  ;;  %v240_v11 = vunpack.c.3.s8 %v112_v7  ;;  %v102_v37 = vld [vmem:[#allocation4 + $0x88] sm:$0xff]  ;;  %v103_v42 = vld [vmem:[#allocation4 + $0x90] sm:$0xff]  ;;  %v104_v47 = vld [vmem:[#allocation4 + $0x98] sm:$0xff] }
  0x16   :  { %v357_v12 = vcvt.s32.f32 %v229_v3  ;;  %v365_v13 = vcvt.s32.f32 %v237_v4  ;;  %v358_v14 = vcvt.s32.f32 %v230_v5  ;;  %v366_v15 = vcvt.s32.f32 %v238_v6 }
  0x17   :  { %v359_v16 = vcvt.s32.f32 %v231_v8  ;;  %v367_v17 = vcvt.s32.f32 %v239_v9  ;;  %v360_v18 = vcvt.s32.f32 %v232_v10  ;;  %v368_v19 = vcvt.s32.f32 %v240_v11  ;;  %v93_v8 = vld [vmem:[#allocation4 + $0x40] sm:$0xff] }
  0x18   :  { %v429_v20 = vpack.c.bf16 %v365_v13, %v357_v12  ;;  %v430_v21 = vpack.c.bf16 %v366_v15, %v358_v14  ;;  %v213_v22 = vunpack.c.0.s8 %v109_v0  ;;  %v221_v23 = vunpack.c.1.s8 %v109_v0 }
  0x19   :  { %v431_v24 = vpack.c.bf16 %v367_v17, %v359_v16  ;;  %v432_v25 = vpack.c.bf16 %v368_v19, %v360_v18  ;;  %v214_v26 = vunpack.c.0.s8 %v110_v1  ;;  %v222_v27 = vunpack.c.1.s8 %v110_v1  ;;  %v94_v17 = vld [vmem:[#allocation4 + $0x48] sm:$0xff] }
  0x1a   :  { %437 = vmatpush.bf16.msra.mxu0 %v429_v20  ;;  %450 = vmatpush.bf16.msra.mxu1 %v430_v21  ;;  %v341_v29 = vcvt.s32.f32 %v213_v22  ;;  %v349_v30 = vcvt.s32.f32 %v221_v23  ;;  %v215_v31 = vunpack.c.0.s8 %v111_v2  ;;  %v223_v32 = vunpack.c.1.s8 %v111_v2  ;;  %v95_v22 = vld [vmem:[#allocation4 + $0x50] sm:$0xff] }
  0x1b   :  { %463 = vmatpush.bf16.msra.mxu2 %v431_v24  ;;  %476 = vmatpush.bf16.msra.mxu3 %v432_v25  ;;  %v342_v33 = vcvt.s32.f32 %v214_v26  ;;  %v350_v34 = vcvt.s32.f32 %v222_v27  ;;  %v216_v35 = vunpack.c.0.s8 %v112_v7  ;;  %v224_v36 = vunpack.c.1.s8 %v112_v7  ;;  %v96_v27 = vld [vmem:[#allocation4 + $0x58] sm:$0xff] }
  0x1c   :  { %v421_v38 = vpack.c.bf16 %v349_v30, %v341_v29  ;;  %v343_v39 = vcvt.s32.f32 %v215_v31  ;;  %v351_v40 = vcvt.s32.f32 %v223_v32  ;;  %v197_v41 = vunpack.c.2.s8 %v101_v28 }
  0x1d   :  { %v422_v43 = vpack.c.bf16 %v350_v34, %v342_v33  ;;  %v344_v44 = vcvt.s32.f32 %v216_v35  ;;  %v352_v45 = vcvt.s32.f32 %v224_v36  ;;  %v205_v46 = vunpack.c.3.s8 %v101_v28 }
  0x1e   :  { %438 = vmatpush.bf16.msra.mxu0 %v421_v38  ;;  %v423_v48 = vpack.c.bf16 %v351_v40, %v343_v39  ;;  %v325_v49 = vcvt.s32.f32 %v197_v41  ;;  %v198_v50 = vunpack.c.2.s8 %v102_v37  ;;  %v206_v51 = vunpack.c.3.s8 %v102_v37 }
  0x1f   :  { %451 = vmatpush.bf16.msra.mxu1 %v422_v43  ;;  %v424_v52 = vpack.c.bf16 %v352_v45, %v344_v44  ;;  %v333_v53 = vcvt.s32.f32 %v205_v46  ;;  %v199_v54 = vunpack.c.2.s8 %v103_v42  ;;  %v207_v55 = vunpack.c.3.s8 %v103_v42 }
  0x20   :  { %464 = vmatpush.bf16.msra.mxu2 %v423_v48  ;;  %v326_v56 = vcvt.s32.f32 %v198_v50  ;;  %v334_v57 = vcvt.s32.f32 %v206_v51  ;;  %v200_v58 = vunpack.c.2.s8 %v104_v47  ;;  %v208_v59 = vunpack.c.3.s8 %v104_v47 }
  0x21   :  { %477 = vmatpush.bf16.msra.mxu3 %v424_v52  ;;  %v413_v60 = vpack.c.bf16 %v333_v53, %v325_v49  ;;  %v327_v61 = vcvt.s32.f32 %v199_v54  ;;  %v335_v62 = vcvt.s32.f32 %v207_v55  ;;  %v181_v63 = vunpack.c.0.s8 %v101_v28  ;;  %v85_v52 = vld [vmem:[#allocation4] sm:$0xff] }
  0x22   :  { %v414_v0 = vpack.c.bf16 %v334_v57, %v326_v56  ;;  %v328_v1 = vcvt.s32.f32 %v200_v58  ;;  %v336_v2 = vcvt.s32.f32 %v208_v59  ;;  %v189_v3 = vunpack.c.1.s8 %v101_v28 }
  0x23   :  { %439 = vmatpush.bf16.msra.mxu0 %v413_v60  ;;  %v415_v4 = vpack.c.bf16 %v335_v62, %v327_v61  ;;  %v309_v5 = vcvt.s32.f32 %v181_v63  ;;  %v182_v6 = vunpack.c.0.s8 %v102_v37  ;;  %v190_v7 = vunpack.c.1.s8 %v102_v37  ;;  %v86_v61 = vld [vmem:[#allocation4 + $0x8] sm:$0xff] }
  0x24   :  { %452 = vmatpush.bf16.msra.mxu1 %v414_v0  ;;  %v416_v9 = vpack.c.bf16 %v336_v2, %v328_v1  ;;  %v317_v10 = vcvt.s32.f32 %v189_v3  ;;  %v183_v11 = vunpack.c.0.s8 %v103_v42  ;;  %v191_v12 = vunpack.c.1.s8 %v103_v42  ;;  %v87_v2 = vld [vmem:[#allocation4 + $0x10] sm:$0xff] }
  0x25   :  { %465 = vmatpush.bf16.msra.mxu2 %v415_v4  ;;  %v310_v13 = vcvt.s32.f32 %v182_v6  ;;  %v318_v14 = vcvt.s32.f32 %v190_v7  ;;  %v184_v15 = vunpack.c.0.s8 %v104_v47  ;;  %v192_v16 = vunpack.c.1.s8 %v104_v47  ;;  %v88_v7 = vld [vmem:[#allocation4 + $0x18] sm:$0xff] }
  0x26   :  { %478 = vmatpush.bf16.msra.mxu3 %v416_v9  ;;  %v405_v18 = vpack.c.bf16 %v317_v10, %v309_v5  ;;  %v311_v19 = vcvt.s32.f32 %v183_v11  ;;  %v319_v20 = vcvt.s32.f32 %v191_v12  ;;  %v165_v21 = vunpack.c.2.s8 %v93_v8 }
  0x27   :  { %v406_v23 = vpack.c.bf16 %v318_v14, %v310_v13  ;;  %v312_v24 = vcvt.s32.f32 %v184_v15  ;;  %v320_v25 = vcvt.s32.f32 %v192_v16  ;;  %v173_v26 = vunpack.c.3.s8 %v93_v8 }
  0x28   :  { %440 = vmatpush.bf16.msra.mxu0 %v405_v18  ;;  %v407_v28 = vpack.c.bf16 %v319_v20, %v311_v19  ;;  %v293_v29 = vcvt.s32.f32 %v165_v21  ;;  %v166_v30 = vunpack.c.2.s8 %v94_v17  ;;  %v174_v31 = vunpack.c.3.s8 %v94_v17 }
  0x29   :  { %453 = vmatpush.bf16.msra.mxu1 %v406_v23  ;;  %v408_v32 = vpack.c.bf16 %v320_v25, %v312_v24  ;;  %v301_v33 = vcvt.s32.f32 %v173_v26  ;;  %v167_v34 = vunpack.c.2.s8 %v95_v22  ;;  %v175_v35 = vunpack.c.3.s8 %v95_v22 }
  0x2a   :  { %466 = vmatpush.bf16.msra.mxu2 %v407_v28  ;;  %v294_v36 = vcvt.s32.f32 %v166_v30  ;;  %v302_v37 = vcvt.s32.f32 %v174_v31  ;;  %v168_v38 = vunpack.c.2.s8 %v96_v27  ;;  %v176_v39 = vunpack.c.3.s8 %v96_v27 }
  0x2b   :  { %479 = vmatpush.bf16.msra.mxu3 %v408_v32  ;;  %v397_v40 = vpack.c.bf16 %v301_v33, %v293_v29  ;;  %v295_v41 = vcvt.s32.f32 %v167_v34  ;;  %v303_v42 = vcvt.s32.f32 %v175_v35  ;;  %v149_v43 = vunpack.c.0.s8 %v93_v8  ;;  %v113_v32 = vld [vmem:[#allocation4 + $0xe0] sm:$0xff] }
  0x2c   :  { %v398_v44 = vpack.c.bf16 %v302_v37, %v294_v36  ;;  %v296_v45 = vcvt.s32.f32 %v168_v38  ;;  %v304_v46 = vcvt.s32.f32 %v176_v39  ;;  %v157_v47 = vunpack.c.1.s8 %v93_v8 }
  0x2d   :  { %441 = vmatpush.bf16.msra.mxu0 %v397_v40  ;;  %v399_v48 = vpack.c.bf16 %v303_v42, %v295_v41  ;;  %v277_v49 = vcvt.s32.f32 %v149_v43  ;;  %v150_v50 = vunpack.c.0.s8 %v94_v17  ;;  %v158_v51 = vunpack.c.1.s8 %v94_v17  ;;  %v114_v41 = vld [vmem:[#allocation4 + $0xe8] sm:$0xff] }
  0x2e   :  { %454 = vmatpush.bf16.msra.mxu1 %v398_v44  ;;  %v400_v53 = vpack.c.bf16 %v304_v46, %v296_v45  ;;  %v285_v54 = vcvt.s32.f32 %v157_v47  ;;  %v151_v55 = vunpack.c.0.s8 %v95_v22  ;;  %v159_v56 = vunpack.c.1.s8 %v95_v22  ;;  %v115_v46 = vld [vmem:[#allocation4 + $0xf0] sm:$0xff] }
  0x2f   :  { %467 = vmatpush.bf16.msra.mxu2 %v399_v48  ;;  %v278_v57 = vcvt.s32.f32 %v150_v50  ;;  %v286_v58 = vcvt.s32.f32 %v158_v51  ;;  %v152_v59 = vunpack.c.0.s8 %v96_v27  ;;  %v160_v60 = vunpack.c.1.s8 %v96_v27  ;;  %v116_v51 = vld [vmem:[#allocation4 + $0xf8] sm:$0xff] }
  0x30   :  { %480 = vmatpush.bf16.msra.mxu3 %v400_v53  ;;  %v389_v62 = vpack.c.bf16 %v285_v54, %v277_v49  ;;  %v279_v63 = vcvt.s32.f32 %v151_v55  ;;  %v287_v0 = vcvt.s32.f32 %v159_v56  ;;  %v133_v1 = vunpack.c.2.s8 %v85_v52  ;;  %v2191_v56 = vld [vmem:[#allocation2] sm:$0xf] }
  0x31   :  { %v390_v3 = vpack.c.bf16 %v286_v58, %v278_v57  ;;  %v280_v4 = vcvt.s32.f32 %v152_v59  ;;  %v288_v5 = vcvt.s32.f32 %v160_v60  ;;  %v141_v6 = vunpack.c.3.s8 %v85_v52 }
  0x32   :  { %442 = vmatpush.bf16.msra.mxu0 %v389_v62  ;;  %v391_v8 = vpack.c.bf16 %v287_v0, %v279_v63  ;;  %v261_v9 = vcvt.s32.f32 %v133_v1  ;;  %v134_v10 = vunpack.c.2.s8 %v86_v61  ;;  %v142_v11 = vunpack.c.3.s8 %v86_v61 }
  0x33   :  { %455 = vmatpush.bf16.msra.mxu1 %v390_v3  ;;  %v392_v12 = vpack.c.bf16 %v288_v5, %v280_v4  ;;  %v269_v13 = vcvt.s32.f32 %v141_v6  ;;  %v135_v14 = vunpack.c.2.s8 %v87_v2  ;;  %v143_v15 = vunpack.c.3.s8 %v87_v2 }
  0x34   :  { %468 = vmatpush.bf16.msra.mxu2 %v391_v8  ;;  %v262_v16 = vcvt.s32.f32 %v134_v10  ;;  %v270_v17 = vcvt.s32.f32 %v142_v11  ;;  %v136_v18 = vunpack.c.2.s8 %v88_v7  ;;  %v144_v19 = vunpack.c.3.s8 %v88_v7 }
  0x35   :  { %481 = vmatpush.bf16.msra.mxu3 %v392_v12  ;;  %v381_v20 = vpack.c.bf16 %v269_v13, %v261_v9  ;;  %v263_v21 = vcvt.s32.f32 %v135_v14  ;;  %v271_v22 = vcvt.s32.f32 %v143_v15  ;;  %v117_v23 = vunpack.c.0.s8 %v85_v52  ;;  %v105_v13 = vld [vmem:[#allocation4 + $0xa0] sm:$0xff] }
  0x36   :  { %v382_v24 = vpack.c.bf16 %v270_v17, %v262_v16  ;;  %v264_v25 = vcvt.s32.f32 %v136_v18  ;;  %v272_v26 = vcvt.s32.f32 %v144_v19  ;;  %v125_v27 = vunpack.c.1.s8 %v85_v52 }
  0x37   :  { %443 = vmatpush.bf16.msra.mxu0 %v381_v20  ;;  %v383_v28 = vpack.c.bf16 %v271_v22, %v263_v21  ;;  %v245_v29 = vcvt.s32.f32 %v117_v23  ;;  %v118_v30 = vunpack.c.0.s8 %v86_v61  ;;  %v126_v31 = vunpack.c.1.s8 %v86_v61  ;;  %v106_v22 = vld [vmem:[#allocation4 + $0xa8] sm:$0xff] }
  0x38   :  { %456 = vmatpush.bf16.msra.mxu1 %v382_v24  ;;  %v384_v33 = vpack.c.bf16 %v272_v26, %v264_v25  ;;  %v253_v34 = vcvt.s32.f32 %v125_v27  ;;  %v119_v35 = vunpack.c.0.s8 %v87_v2  ;;  %v127_v36 = vunpack.c.1.s8 %v87_v2  ;;  %v107_v27 = vld [vmem:[#allocation4 + $0xb0] sm:$0xff] }
  0x39   :  { %469 = vmatpush.bf16.msra.mxu2 %v383_v28  ;;  %v246_v37 = vcvt.s32.f32 %v118_v30  ;;  %v254_v38 = vcvt.s32.f32 %v126_v31  ;;  %v120_v39 = vunpack.c.0.s8 %v88_v7  ;;  %v128_v40 = vunpack.c.1.s8 %v88_v7 }
  0x3a   :  { %482 = vmatpush.bf16.msra.mxu3 %v384_v33  ;;  %v373_v42 = vpack.c.bf16 %v253_v34, %v245_v29  ;;  %v247_v43 = vcvt.s32.f32 %v119_v35  ;;  %v255_v44 = vcvt.s32.f32 %v127_v36  ;;  %v233_v45 = vunpack.c.2.s8 %v113_v32 }
  0x3b   :  { %v374_v47 = vpack.c.bf16 %v254_v38, %v246_v37  ;;  %v248_v48 = vcvt.s32.f32 %v120_v39  ;;  %v256_v49 = vcvt.s32.f32 %v128_v40  ;;  %v241_v50 = vunpack.c.3.s8 %v113_v32 }
  0x3c   :  { %444 = vmatpush.bf16.msra.mxu0 %v373_v42  ;;  %v375_v52 = vpack.c.bf16 %v255_v44, %v247_v43  ;;  %v361_v53 = vcvt.s32.f32 %v233_v45  ;;  %v234_v54 = vunpack.c.2.s8 %v114_v41  ;;  %v242_v55 = vunpack.c.3.s8 %v114_v41 }
  0x3d   :  { %457 = vmatpush.bf16.msra.mxu1 %v374_v47  ;;  %v376_v57 = vpack.c.bf16 %v256_v49, %v248_v48  ;;  %v369_v58 = vcvt.s32.f32 %v241_v50  ;;  %v235_v59 = vunpack.c.2.s8 %v115_v46  ;;  %v243_v60 = vunpack.c.3.s8 %v115_v46 }
  0x3e   :  { %470 = vmatpush.bf16.msra.mxu2 %v375_v52  ;;  %v362_v61 = vcvt.s32.f32 %v234_v54  ;;  %v370_v62 = vcvt.s32.f32 %v242_v55  ;;  %v236_v63 = vunpack.c.2.s8 %v116_v51  ;;  %v244_v0 = vunpack.c.3.s8 %v116_v51 }
  0x3f   :  { %483 = vmatpush.bf16.msra.mxu3 %v376_v57  ;;  %v433_v1 = vpack.c.bf16 %v369_v58, %v361_v53  ;;  %v363_v2 = vcvt.s32.f32 %v235_v59  ;;  %v371_v3 = vcvt.s32.f32 %v243_v60  ;;  %445 = vmatmul.bf16.vlgmr.msra.gmra.mxu0 %v2191_v56  ;;  %v217_v4 = vunpack.c.0.s8 %v113_v32  ;;  %v97_v58 = vld [vmem:[#allocation4 + $0x60] sm:$0xff] }
  0x40   :  { %v434_v5 = vpack.c.bf16 %v370_v62, %v362_v61  ;;  %v364_v6 = vcvt.s32.f32 %v236_v63  ;;  %v372_v7 = vcvt.s32.f32 %v244_v0  ;;  %458 = vmatmul.bf16.vlgmr.msra.gmra.mxu1 %v2191_v56  ;;  %v225_v8 = vunpack.c.1.s8 %v113_v32  ;;  %v108_v32 = vld [vmem:[#allocation4 + $0xb8] sm:$0xff] }
  0x41   :  { %489 = vmatpush.bf16.msrb.mxu0 %v433_v1  ;;  %v435_v9 = vpack.c.bf16 %v371_v3, %v363_v2  ;;  %471 = vmatmul.bf16.vlgmr.msra.gmra.mxu2 %v2191_v56  ;;  %v345_v10 = vcvt.s32.f32 %v217_v4  ;;  %v218_v11 = vunpack.c.0.s8 %v114_v41  ;;  %v226_v12 = vunpack.c.1.s8 %v114_v41  ;;  %v98_v3 = vld [vmem:[#allocation4 + $0x68] sm:$0xff] }
  0x42   :  { %502 = vmatpush.bf16.msrb.mxu1 %v434_v5  ;;  %v436_v14 = vpack.c.bf16 %v372_v7, %v364_v6  ;;  %484 = vmatmul.bf16.vlgmr.msra.gmra.mxu3 %v2191_v56  ;;  %v353_v15 = vcvt.s32.f32 %v225_v8  ;;  %v219_v16 = vunpack.c.0.s8 %v115_v46  ;;  %v227_v17 = vunpack.c.1.s8 %v115_v46  ;;  %v99_v8 = vld [vmem:[#allocation4 + $0x70] sm:$0xff] }
  0x43   :  { %515 = vmatpush.bf16.msrb.mxu2 %v435_v9  ;;  %v346_v18 = vcvt.s32.f32 %v218_v11  ;;  %v354_v19 = vcvt.s32.f32 %v226_v12  ;;  %v220_v20 = vunpack.c.0.s8 %v116_v51  ;;  %v228_v21 = vunpack.c.1.s8 %v116_v51 }
  0x44   :  { %528 = vmatpush.bf16.msrb.mxu3 %v436_v14  ;;  %v425_v23 = vpack.c.bf16 %v353_v15, %v345_v10  ;;  %v347_v24 = vcvt.s32.f32 %v219_v16  ;;  %v355_v25 = vcvt.s32.f32 %v227_v17  ;;  %v201_v26 = vunpack.c.2.s8 %v105_v13 }
  0x45   :  { %v426_v28 = vpack.c.bf16 %v354_v19, %v346_v18  ;;  %v348_v29 = vcvt.s32.f32 %v220_v20  ;;  %v356_v30 = vcvt.s32.f32 %v228_v21  ;;  %v209_v31 = vunpack.c.3.s8 %v105_v13 }
  0x46   :  { %490 = vmatpush.bf16.msrb.mxu0 %v425_v23  ;;  %v427_v33 = vpack.c.bf16 %v355_v25, %v347_v24  ;;  %v329_v34 = vcvt.s32.f32 %v201_v26  ;;  %v202_v35 = vunpack.c.2.s8 %v106_v22  ;;  %v210_v36 = vunpack.c.3.s8 %v106_v22 }
  0x47   :  { %503 = vmatpush.bf16.msrb.mxu1 %v426_v28  ;;  %v428_v37 = vpack.c.bf16 %v356_v30, %v348_v29  ;;  %v337_v38 = vcvt.s32.f32 %v209_v31  ;;  %v203_v39 = vunpack.c.2.s8 %v107_v27  ;;  %v211_v40 = vunpack.c.3.s8 %v107_v27 }
  0x48   :  { %516 = vmatpush.bf16.msrb.mxu2 %v427_v33  ;;  %v330_v41 = vcvt.s32.f32 %v202_v35  ;;  %v338_v42 = vcvt.s32.f32 %v210_v36  ;;  %v204_v43 = vunpack.c.2.s8 %v108_v32  ;;  %v212_v44 = vunpack.c.3.s8 %v108_v32 }
  0x49   :  { %529 = vmatpush.bf16.msrb.mxu3 %v428_v37  ;;  %v417_v45 = vpack.c.bf16 %v337_v38, %v329_v34  ;;  %v331_v46 = vcvt.s32.f32 %v203_v39  ;;  %v339_v47 = vcvt.s32.f32 %v211_v40  ;;  %v185_v48 = vunpack.c.0.s8 %v105_v13  ;;  %v89_v38 = vld [vmem:[#allocation4 + $0x20] sm:$0xff] }
  0x4a   :  { %v418_v49 = vpack.c.bf16 %v338_v42, %v330_v41  ;;  %v332_v50 = vcvt.s32.f32 %v204_v43  ;;  %v340_v51 = vcvt.s32.f32 %v212_v44  ;;  %v193_v52 = vunpack.c.1.s8 %v105_v13  ;;  %v100_v13 = vld [vmem:[#allocation4 + $0x78] sm:$0xff] }
  0x4b   :  { %491 = vmatpush.bf16.msrb.mxu0 %v417_v45  ;;  %v419_v53 = vpack.c.bf16 %v339_v47, %v331_v46  ;;  %v313_v54 = vcvt.s32.f32 %v185_v48  ;;  %v186_v55 = vunpack.c.0.s8 %v106_v22  ;;  %v194_v57 = vunpack.c.1.s8 %v106_v22  ;;  %v90_v47 = vld [vmem:[#allocation4 + $0x28] sm:$0xff] }
  0x4c   :  { %504 = vmatpush.bf16.msrb.mxu1 %v418_v49  ;;  %v420_v59 = vpack.c.bf16 %v340_v51, %v332_v50  ;;  %v321_v60 = vcvt.s32.f32 %v193_v52  ;;  %v187_v61 = vunpack.c.0.s8 %v107_v27  ;;  %v195_v62 = vunpack.c.1.s8 %v107_v27  ;;  %v91_v52 = vld [vmem:[#allocation4 + $0x30] sm:$0xff] }
  0x4d   :  { %517 = vmatpush.bf16.msrb.mxu2 %v419_v53  ;;  %v314_v63 = vcvt.s32.f32 %v186_v55  ;;  %v322_v0 = vcvt.s32.f32 %v194_v57  ;;  %v188_v1 = vunpack.c.0.s8 %v108_v32  ;;  %v196_v2 = vunpack.c.1.s8 %v108_v32 }
  0x4e   :  { %530 = vmatpush.bf16.msrb.mxu3 %v420_v59  ;;  %v409_v4 = vpack.c.bf16 %v321_v60, %v313_v54  ;;  %v315_v5 = vcvt.s32.f32 %v187_v61  ;;  %v323_v6 = vcvt.s32.f32 %v195_v62  ;;  %v169_v7 = vunpack.c.2.s8 %v97_v58 }
  0x4f   :  { %v410_v9 = vpack.c.bf16 %v322_v0, %v314_v63  ;;  %v316_v10 = vcvt.s32.f32 %v188_v1  ;;  %v324_v11 = vcvt.s32.f32 %v196_v2  ;;  %v177_v12 = vunpack.c.3.s8 %v97_v58 }
  0x50   :  { %492 = vmatpush.bf16.msrb.mxu0 %v409_v4  ;;  %v411_v14 = vpack.c.bf16 %v323_v6, %v315_v5  ;;  %v297_v15 = vcvt.s32.f32 %v169_v7  ;;  %v170_v16 = vunpack.c.2.s8 %v98_v3  ;;  %v178_v17 = vunpack.c.3.s8 %v98_v3 }
  0x51   :  { %505 = vmatpush.bf16.msrb.mxu1 %v410_v9  ;;  %v412_v18 = vpack.c.bf16 %v324_v11, %v316_v10  ;;  %v305_v19 = vcvt.s32.f32 %v177_v12  ;;  %v171_v20 = vunpack.c.2.s8 %v99_v8  ;;  %v179_v21 = vunpack.c.3.s8 %v99_v8 }
  0x52   :  { %518 = vmatpush.bf16.msrb.mxu2 %v411_v14  ;;  %v298_v22 = vcvt.s32.f32 %v170_v16  ;;  %v306_v23 = vcvt.s32.f32 %v178_v17  ;;  %v172_v24 = vunpack.c.2.s8 %v100_v13  ;;  %v180_v25 = vunpack.c.3.s8 %v100_v13 }
  0x53   :  { %531 = vmatpush.bf16.msrb.mxu3 %v412_v18  ;;  %v401_v26 = vpack.c.bf16 %v305_v19, %v297_v15  ;;  %v299_v27 = vcvt.s32.f32 %v171_v20  ;;  %v307_v28 = vcvt.s32.f32 %v179_v21  ;;  %v153_v29 = vunpack.c.0.s8 %v97_v58 }
  0x54   :  { %v402_v30 = vpack.c.bf16 %v306_v23, %v298_v22  ;;  %v300_v31 = vcvt.s32.f32 %v172_v24  ;;  %v308_v32 = vcvt.s32.f32 %v180_v25  ;;  %v161_v33 = vunpack.c.1.s8 %v97_v58  ;;  %v92_v58 = vld [vmem:[#allocation4 + $0x38] sm:$0xff] }
  0x55   :  { %493 = vmatpush.bf16.msrb.mxu0 %v401_v26  ;;  %v403_v34 = vpack.c.bf16 %v307_v28, %v299_v27  ;;  %v281_v35 = vcvt.s32.f32 %v153_v29  ;;  %v154_v36 = vunpack.c.0.s8 %v98_v3  ;;  %v162_v37 = vunpack.c.1.s8 %v98_v3 }
  0x56   :  { %506 = vmatpush.bf16.msrb.mxu1 %v402_v30  ;;  %v404_v39 = vpack.c.bf16 %v308_v32, %v300_v31  ;;  %v289_v40 = vcvt.s32.f32 %v161_v33  ;;  %v155_v41 = vunpack.c.0.s8 %v99_v8  ;;  %v163_v42 = vunpack.c.1.s8 %v99_v8 }
  0x57   :  { %519 = vmatpush.bf16.msrb.mxu2 %v403_v34  ;;  %v282_v43 = vcvt.s32.f32 %v154_v36  ;;  %v290_v44 = vcvt.s32.f32 %v162_v37  ;;  %v156_v45 = vunpack.c.0.s8 %v100_v13  ;;  %v164_v46 = vunpack.c.1.s8 %v100_v13  ;;  %v2203_v36 = vld [vmem:[#allocation7] sm:$0xff] }
  0x58   :  { %532 = vmatpush.bf16.msrb.mxu3 %v404_v39  ;;  %v393_v48 = vpack.c.bf16 %v289_v40, %v281_v35  ;;  %v283_v49 = vcvt.s32.f32 %v155_v41  ;;  %v291_v50 = vcvt.s32.f32 %v163_v42  ;;  %v137_v51 = vunpack.c.2.s8 %v89_v38 }
  0x59   :  { %v394_v53 = vpack.c.bf16 %v290_v44, %v282_v43  ;;  %v284_v54 = vcvt.s32.f32 %v156_v45  ;;  %v292_v55 = vcvt.s32.f32 %v164_v46  ;;  %v145_v57 = vunpack.c.3.s8 %v89_v38 }
  0x5a   :  { %494 = vmatpush.bf16.msrb.mxu0 %v393_v48  ;;  %v395_v59 = vpack.c.bf16 %v291_v50, %v283_v49  ;;  %v265_v60 = vcvt.s32.f32 %v137_v51  ;;  %v138_v61 = vunpack.c.2.s8 %v90_v47  ;;  %v146_v62 = vunpack.c.3.s8 %v90_v47 }
  0x5b   :  { %507 = vmatpush.bf16.msrb.mxu1 %v394_v53  ;;  %v396_v63 = vpack.c.bf16 %v292_v55, %v284_v54  ;;  %v273_v0 = vcvt.s32.f32 %v145_v57  ;;  %v139_v1 = vunpack.c.2.s8 %v91_v52  ;;  %v147_v2 = vunpack.c.3.s8 %v91_v52 }
  0x5c   :  { %520 = vmatpush.bf16.msrb.mxu2 %v395_v59  ;;  %v266_v3 = vcvt.s32.f32 %v138_v61  ;;  %v274_v4 = vcvt.s32.f32 %v146_v62  ;;  %v140_v5 = vunpack.c.2.s8 %v92_v58  ;;  %v148_v6 = vunpack.c.3.s8 %v92_v58 }
  0x5d   :  { %533 = vmatpush.bf16.msrb.mxu3 %v396_v63  ;;  %v385_v7 = vpack.c.bf16 %v273_v0, %v265_v60  ;;  %v267_v8 = vcvt.s32.f32 %v139_v1  ;;  %v275_v9 = vcvt.s32.f32 %v147_v2  ;;  %v121_v10 = vunpack.c.0.s8 %v89_v38 }
  0x5e   :  { %v386_v11 = vpack.c.bf16 %v274_v4, %v266_v3  ;;  %v268_v12 = vcvt.s32.f32 %v140_v5  ;;  %v276_v13 = vcvt.s32.f32 %v148_v6  ;;  %v129_v14 = vunpack.c.1.s8 %v89_v38 }
  0x5f   :  { %495 = vmatpush.bf16.msrb.mxu0 %v385_v7  ;;  %v387_v15 = vpack.c.bf16 %v275_v9, %v267_v8  ;;  %v249_v16 = vcvt.s32.f32 %v121_v10  ;;  %v122_v17 = vunpack.c.0.s8 %v90_v47  ;;  %v130_v18 = vunpack.c.1.s8 %v90_v47 }
  0x60   :  { %508 = vmatpush.bf16.msrb.mxu1 %v386_v11  ;;  %v388_v19 = vpack.c.bf16 %v276_v13, %v268_v12  ;;  %v257_v20 = vcvt.s32.f32 %v129_v14  ;;  %v123_v21 = vunpack.c.0.s8 %v91_v52  ;;  %v131_v22 = vunpack.c.1.s8 %v91_v52 }
  0x61   :  { %521 = vmatpush.bf16.msrb.mxu2 %v387_v15  ;;  %v250_v23 = vcvt.s32.f32 %v122_v17  ;;  %v258_v24 = vcvt.s32.f32 %v130_v18  ;;  %v124_v25 = vunpack.c.0.s8 %v92_v58  ;;  %v132_v26 = vunpack.c.1.s8 %v92_v58 }
  0x62   :  { %534 = vmatpush.bf16.msrb.mxu3 %v388_v19  ;;  %v377_v27 = vpack.c.bf16 %v257_v20, %v249_v16  ;;  %v251_v28 = vcvt.s32.f32 %v123_v21  ;;  %v259_v29 = vcvt.s32.f32 %v131_v22  ;;  %v662_v52 = vperm.slane %v2203_v36, 0 }
  0x63   :  { %v378_v30 = vpack.c.bf16 %v258_v24, %v250_v23  ;;  %v252_v31 = vcvt.s32.f32 %v124_v25  ;;  %v260_v32 = vcvt.s32.f32 %v132_v26  ;;  %v663_v57 = vperm.slane %v2203_v36, 1 }
  0x64   :  { %496 = vmatpush.bf16.msrb.mxu0 %v377_v27  ;;  %v379_v33 = vpack.c.bf16 %v259_v29, %v251_v28  ;;  %vm843_vm13 = vcmask 1041408  }
  0x65   :  { %509 = vmatpush.bf16.msrb.mxu1 %v378_v30  ;;  %v380_v34 = vpack.c.bf16 %v260_v32, %v252_v31 }
  0x66   :  { %522 = vmatpush.bf16.msrb.mxu2 %v379_v33 }
  0x67   :  { %535 = vmatpush.bf16.msrb.mxu3 %v380_v34  ;;  %497 = vmatmul.bf16.vlgmr.msrb.gmra.mxu0 %v2191_v56 }
  0x68   :  { %510 = vmatmul.bf16.vlgmr.msrb.gmra.mxu1 %v2191_v56 }
  0x69   :  { %523 = vmatmul.bf16.vlgmr.msrb.gmra.mxu2 %v2191_v56 }
  0x6a   :  { %536 = vmatmul.bf16.vlgmr.msrb.gmra.mxu3 %v2191_v56  ;;  %v2216_v56 = vmul.f32 %v2203_v36, %v2203_v36 }
  0x6c   :  { %v688_v53 = vperm.slane %v2216_v56, 0  ;;  %v689_v12 = vperm.slane %v2216_v56, 1 }
  0xbc   :  { %v2201_v35 = vpop.f32.mrf.mxu0 }
  0xbd   :  { %v541_v37 = vrot.slane %v2201_v35, 4  ;;  %v597_v38 = vmul.f32 %v2201_v35, %v2201_v35  ;;  %v2208_v39 = vpop.f32.mrf.mxu1 }
  0xbe   :  { %v547_v40 = vrot.slane %v2208_v39, 4  ;;  %v598_v41 = vmul.f32 %v2208_v39, %v2208_v39 }
  0xbf   :  { %v542_v42 = vadd.f32 %v541_v37, %v2201_v35  ;;  %v605_v43 = vrot.slane %v597_v38, 4 }
  0xc0   :  { %v548_v44 = vadd.f32 %v547_v40, %v2208_v39  ;;  %v611_v45 = vrot.slane %v598_v41, 4 }
  0xc1   :  { %v543_v46 = vrot.slane %v542_v42, 2  ;;  %v606_v47 = vadd.f32 %v605_v43, %v597_v38 }
  0xc2   :  { %v549_v48 = vrot.slane %v548_v44, 2  ;;  %v612_v49 = vadd.f32 %v611_v45, %v598_v41 }
  0xc3   :  { %v544_v50 = vadd.f32 %v543_v46, %v542_v42  ;;  %v607_v51 = vrot.slane %v606_v47, 2  ;;  %v664_v46 = vperm.slane %v2203_v36, 2 }
  0xc4   :  { %v550_v54 = vadd.f32 %v549_v48, %v548_v44  ;;  %v613_v55 = vrot.slane %v612_v49, 2  ;;  %v2222_v58 = vpop.f32.mrf.mxu2  ;;  %v448_v59 = vpop.f32.mrf.mxu0 }
  0xc5   :  { %v545_v60 = vrot.slane %v544_v50, 1  ;;  %v608_v61 = vadd.f32 %v607_v51, %v606_v47  ;;  %v553_v62 = vrot.slane %v2222_v58, 4  ;;  %v599_v63 = vmul.f32 %v2222_v58, %v2222_v58  ;;  %v2227_v0 = vpop.f32.mrf.mxu3  ;;  %v461_v1 = vpop.f32.mrf.mxu1 }
  0xc6   :  { %v551_v2 = vrot.slane %v550_v54, 1  ;;  %v614_v3 = vadd.f32 %v613_v55, %v612_v49  ;;  %v559_v4 = vrot.slane %v2227_v0, 4  ;;  %v600_v5 = vmul.f32 %v2227_v0, %v2227_v0 }
  0xc7   :  { %v546_v6 = vadd.f32 %v545_v60, %v544_v50  ;;  %v609_v7 = vrot.slane %v608_v61, 1  ;;  %v554_v8 = vadd.f32 %v553_v62, %v2222_v58  ;;  %v617_v9 = vrot.slane %v599_v63, 4 }
  0xc8   :  { %v552_v10 = vadd.f32 %v551_v2, %v550_v54  ;;  %v615_v11 = vrot.slane %v614_v3, 1  ;;  %v560_v13 = vadd.f32 %v559_v4, %v2227_v0  ;;  %v623_v21 = vrot.slane %v600_v5, 4 }
  0xc9   :  { %v589_v14 = vmul.f32 0.125, %v546_v6  ;;  %v610_v15 = vadd.f32 %v609_v7, %v608_v61  ;;  %v555_v16 = vrot.slane %v554_v8, 2  ;;  %v618_v17 = vadd.f32 %v617_v9, %v599_v63 }
  0xca   :  { %v590_v18 = vmul.f32 0.125, %v552_v10  ;;  %v616_v19 = vadd.f32 %v615_v11, %v614_v3  ;;  %v561_v20 = vrot.slane %v560_v13, 2  ;;  %v624_v29 = vadd.f32 %v623_v21, %v600_v5 }
  0xcb   :  { %v653_v22 = vmul.f32 0.125, %v610_v15  ;;  %v2235_v23 = vmul.f32 %v662_v52, %v589_v14  ;;  %v556_v24 = vadd.f32 %v555_v16, %v554_v8  ;;  %v619_v25 = vrot.slane %v618_v17, 2  ;;  %v2265_v14 = vld [vmem:[#allocation6 + $0x30] sm:$0xff] }
  0xcc   :  { %v654_v26 = vmul.f32 0.125, %v616_v19  ;;  %v2237_v27 = vmul.f32 %v663_v57, %v590_v18  ;;  %v562_v28 = vadd.f32 %v561_v20, %v560_v13  ;;  %v474_v30 = vpop.f32.mrf.mxu2  ;;  %v625_v42 = vrot.slane %v624_v29, 2  ;;  %v2272_v19 = vld [vmem:[#allocation6 + $0x70] sm:$0xff] }
  0xcd   :  { %v704_v31 = vmul.f32 %v688_v53, %v653_v22  ;;  %v712_v32 = vmul.f32 %v2235_v23, %v2235_v23  ;;  %v557_v33 = vrot.slane %v556_v24, 1  ;;  %v620_v34 = vadd.f32 %v619_v25, %v618_v17  ;;  %v487_v37 = vpop.f32.mrf.mxu3 }
  0xce   :  { %v705_v38 = vmul.f32 %v689_v12, %v654_v26  ;;  %v713_v40 = vmul.f32 %v2237_v27, %v2237_v27  ;;  %v563_v41 = vrot.slane %v562_v28, 1  ;;  %v626_v49 = vadd.f32 %v625_v42, %v624_v29  ;;  %v2282_v26 = vld [vmem:[#allocation6 + $0xb0] sm:$0xff] }
  0xcf   :  { %v720_v43 = vsub.f32 %v704_v31, %v712_v32  ;;  %v558_v44 = vadd.f32 %v557_v33, %v556_v24  ;;  %v621_v45 = vrot.slane %v620_v34, 1  ;;  %v665_v50 = vperm.slane %v2203_v36, 3 }
  0xd0   :  { %v721_v47 = vsub.f32 %v705_v38, %v713_v40  ;;  %v564_v48 = vadd.f32 %v563_v41, %v562_v28  ;;  %v690_v54 = vperm.slane %v2216_v56, 2  ;;  %v627_v59 = vrot.slane %v626_v49, 1 }
  0xd1   :  { %v728_v51 = vmax.f32 %v720_v43, 0.0  ;;  %v591_v52 = vmul.f32 0.125, %v558_v44  ;;  %v622_v53 = vadd.f32 %v621_v45, %v620_v34  ;;  %v691_v3 = vperm.slane %v2216_v56, 3 }
  0xd2   :  { %v729_v55 = vmax.f32 %v721_v47, 0.0  ;;  %v592_v57 = vmul.f32 0.125, %v564_v48  ;;  %v628_v1 = vadd.f32 %v627_v59, %v626_v49  ;;  %v1055_v18 = vunpack.c.2.s8 %v2265_v14 }
  0xd3   :  { %v2246_v60 = vadd.f32 1e-05, %v728_v51  ;;  %v655_v61 = vmul.f32 0.125, %v622_v53  ;;  %v2248_v62 = vmul.f32 %v664_v46, %v591_v52  ;;  %v666_v24 = vperm.slane %v2203_v36, 4 }
  0xd4   :  { %v2250_v63 = vadd.f32 1e-05, %v729_v55  ;;  %v2252_v2 = vmul.f32 %v665_v50, %v592_v57  ;;  %v656_v6 = vmul.f32 0.125, %v628_v1  ;;  %v1057_v25 = vunpack.c.3.s8 %v2265_v14  ;;  %v2297_v50 = vld [vmem:[#allocation6 + $0xf0] sm:$0xff] }
  0xd5   :  { %2024 = vrsqrt.f32 %v2246_v60  ;;  %v706_v4 = vmul.f32 %v690_v54, %v655_v61  ;;  %v714_v5 = vmul.f32 %v2248_v62, %v2248_v62  ;;  %v1311_v29 = vcvt.s32.f32 %v1055_v18 }
  0xd6   :  { %2026 = vrsqrt.f32 %v2250_v63  ;;  %v715_v7 = vmul.f32 %v2252_v2, %v2252_v2  ;;  %v707_v9 = vmul.f32 %v691_v3, %v656_v6  ;;  %v1087_v30 = vunpack.c.2.s8 %v2272_v19 }
  0xd7   :  { %v722_v8 = vsub.f32 %v706_v4, %v714_v5  ;;  %v1089_v31 = vunpack.c.3.s8 %v2272_v19  ;;  %vm760_vm0 = vweird.f32 %v2250_v63  ;;  %v1313_v33 = vcvt.s32.f32 %v1057_v25 }
  0xd8   :  { %v723_v11 = vsub.f32 %v707_v9, %v715_v7  ;;  %v1343_v37 = vcvt.s32.f32 %v1087_v30  ;;  %v1119_v40 = vunpack.c.2.s8 %v2282_v26  ;;  %v692_v41 = vperm.slane %v2216_v56, 4 }
  0xd9   :  { %v730_v10 = vmax.f32 %v722_v8, 0.0  ;;  %v1345_v38 = vcvt.s32.f32 %v1089_v31  ;;  %v667_v42 = vperm.slane %v2203_v36, 5  ;;  %v693_v43 = vperm.slane %v2216_v56, 5 }
  0xda   :  { %v731_v17 = vmax.f32 %v723_v11, 0.0  ;;  %v1553_v44 = vpack.c.bf16 %v1313_v33, %v1311_v29  ;;  %v668_v47 = vperm.slane %v2203_v36, 6  ;;  %v1121_v49 = vunpack.c.3.s8 %v2282_v26 }
  0xdb   :  { %v2261_v12 = vpop.eup %2024  ;;  %v2263_v13 = vadd.f32 1e-05, %v730_v10  ;;  %v1569_v48 = vpack.c.bf16 %v1345_v38, %v1343_v37  ;;  %v694_v54 = vperm.slane %v2216_v56, 6  ;;  %v669_v61 = vperm.slane %v2203_v36, 7 }
  0xdc   :  { %v2267_v15 = vpop.eup %2026  ;;  %v745_v16 = vmul.f32 %v2261_v12, %v2246_v60  ;;  %v2278_v22 = vadd.f32 1e-05, %v731_v17  ;;  %1675 = vmatpush.bf16.msra.mxu0 %v1553_v44  ;;  %v1375_v1 = vcvt.s32.f32 %v1119_v40  ;;  %v1151_v7 = vunpack.c.2.s8 %v2297_v50 }
  0xdd   :  { %v755_v20 = vmul.f32 %v2267_v15, %v2250_v63  ;;  %2028 = vrsqrt.f32 %v2263_v13  ;;  %vm761_vm1 = vweird.f32 %v2267_v15  ;;  %vm770_vm2 = vweird.f32 %v2263_v13  ;;  %1688 = vmatpush.bf16.msra.mxu1 %v1569_v48 }
  0xde   :  { %v746_v21 = vmul.f32 %v2261_v12, %v745_v16  ;;  %2030 = vrsqrt.f32 %v2278_v22  ;;  %v1377_v11 = vcvt.s32.f32 %v1121_v49  ;;  %vm2334_vm4 = vmor %vm760_vm0, %vm761_vm1  ;;  %vm780_vm5 = vweird.f32 %v2278_v22 }
  0xdf   :  { %v756_v28 = vmul.f32 %v2267_v15, %v755_v20  ;;  %vm750_vm8 = vweird.f32 %v2246_v60  ;;  %vm751_vm9 = vweird.f32 %v2261_v12 }
  0xe0   :  { %v747_v32 = vmul.f32 0.5, %v746_v21  ;;  %v1585_v40 = vpack.c.bf16 %v1377_v11, %v1375_v1  ;;  %vm752_vm14 = vmor %vm750_vm8, %vm751_vm9 }
  0xe1   :  { %v757_v34 = vmul.f32 0.5, %v756_v28 }
  0xe2   :  { %v748_v46 = vsub.f32 1.5, %v747_v32  ;;  %v695_v32 = vperm.slane %v2216_v56, 7  ;;  %1701 = vmatpush.bf16.msra.mxu2 %v1585_v40 }
  0xe3   :  { %v2293_v45 = vpop.eup %2028  ;;  %v758_v51 = vsub.f32 1.5, %v757_v34 }
  0xe4   :  { %v765_v52 = vmul.f32 %v2293_v45, %v2263_v13  ;;  %v2302_v53 = vpop.f32.mrf.mxu0  ;;  %v2312_v3 = vpop.eup %2030  ;;  %v2320_v8 = vmul.f32 %v2261_v12, %v748_v46  ;;  %vm771_vm3 = vweird.f32 %v2293_v45 }
  0xe5   :  { %v565_v55 = vrot.slane %v2302_v53, 4  ;;  %v601_v57 = vmul.f32 %v2302_v53, %v2302_v53  ;;  %v2309_v59 = vpop.f32.mrf.mxu1  ;;  %v775_v9 = vmul.f32 %v2312_v3, %v2278_v22  ;;  %v759_v16 = vmul.f32 %v2267_v15, %v758_v51  ;;  %vm2358_vm7 = vmor %vm770_vm2, %vm771_vm3 }
  0xe6   :  { %v766_v4 = vmul.f32 %v2293_v45, %v765_v52  ;;  %v571_v5 = vrot.slane %v2309_v59, 4  ;;  %v602_v6 = vmul.f32 %v2309_v59, %v2309_v59  ;;  %vm781_vm6 = vweird.f32 %v2312_v3 }
  0xe7   :  { %v566_v10 = vadd.f32 %v565_v55, %v2302_v53  ;;  %v629_v18 = vrot.slane %v601_v57, 4  ;;  %v776_v21 = vmul.f32 %v2312_v3, %v775_v9  ;;  %v763_v44 = vsel %vm2334_vm4, %v2267_v15, %v759_v16  ;;  %vm2385_vm12 = vmor %vm780_vm5, %vm781_vm6 }
  0xe8   :  { %v767_v17 = vmul.f32 0.5, %v766_v4  ;;  %v572_v20 = vadd.f32 %v571_v5, %v2309_v59  ;;  %v635_v28 = vrot.slane %v602_v6, 4  ;;  %vm845_vm3 = vcmask 1044484  }
  0xe9   :  { %v567_v25 = vrot.slane %v566_v10, 2  ;;  %v630_v30 = vadd.f32 %v629_v18, %v601_v57  ;;  %v777_v34 = vmul.f32 0.5, %v776_v21 }
  0xea   :  { %v768_v29 = vsub.f32 1.5, %v767_v17  ;;  %v573_v31 = vrot.slane %v572_v20, 2  ;;  %v636_v38 = vadd.f32 %v635_v28, %v602_v6  ;;  %v1153_v17 = vunpack.c.3.s8 %v2297_v50 }
  0xeb   :  { %v568_v37 = vadd.f32 %v567_v25, %v566_v10  ;;  %v631_v46 = vrot.slane %v630_v30, 2  ;;  %v778_v5 = vsub.f32 1.5, %v777_v34  ;;  %v2351_v10 = vrot.slane %v763_v44, 7 }
  0xec   :  { %v574_v48 = vadd.f32 %v573_v31, %v572_v20  ;;  %v2343_v49 = vpop.f32.mrf.mxu2  ;;  %v500_v63 = vpop.f32.mrf.mxu0  ;;  %v769_v51 = vmul.f32 %v2293_v45, %v768_v29  ;;  %v637_v55 = vrot.slane %v636_v38, 2 }
  0xed   :  { %v569_v52 = vrot.slane %v568_v37, 1  ;;  %v577_v57 = vrot.slane %v2343_v49, 4  ;;  %v2347_v4 = vpop.f32.mrf.mxu3  ;;  %v513_v1 = vpop.f32.mrf.mxu1  ;;  %v632_v6 = vadd.f32 %v631_v46, %v630_v30  ;;  %v603_v9 = vmul.f32 %v2343_v49, %v2343_v49 }
  0xee   :  { %v575_v15 = vrot.slane %v574_v48, 1  ;;  %v638_v16 = vadd.f32 %v637_v55, %v636_v38  ;;  %v773_v29 = vsel %vm2358_vm7, %v2293_v45, %v769_v51  ;;  %v583_v33 = vrot.slane %v2347_v4, 4 }
  0xef   :  { %v570_v11 = vadd.f32 %v569_v52, %v568_v37  ;;  %v633_v20 = vrot.slane %v632_v6, 1  ;;  %v578_v25 = vadd.f32 %v577_v57, %v2343_v49  ;;  %v641_v28 = vrot.slane %v603_v9, 4 }
  0xf0   :  { %v576_v21 = vadd.f32 %v575_v15, %v574_v48  ;;  %v639_v31 = vrot.slane %v638_v16, 1  ;;  %v779_v34 = vmul.f32 %v2312_v3, %v778_v5  ;;  %v584_v48 = vadd.f32 %v583_v33, %v2347_v4 }
  0xf1   :  { %v593_v30 = vmul.f32 0.125, %v570_v11  ;;  %v634_v13 = vadd.f32 %v633_v20, %v632_v6  ;;  %v579_v38 = vrot.slane %v578_v25, 2  ;;  %v642_v46 = vadd.f32 %v641_v28, %v603_v9 }
  0xf2   :  { %v594_v37 = vmul.f32 0.125, %v576_v21  ;;  %v640_v44 = vadd.f32 %v639_v31, %v638_v16  ;;  %v833_v45 = vrot.slane %v773_v29, 6  ;;  %v585_v5 = vrot.slane %v584_v48, 2 }
  0xf3   :  { %v2370_v40 = vmul.f32 %v666_v24, %v593_v30  ;;  %v657_v63 = vmul.f32 0.125, %v634_v13  ;;  %v580_v52 = vadd.f32 %v579_v38, %v578_v25  ;;  %v643_v1 = vrot.slane %v642_v46, 2 }
  0xf4   :  { %v2377_v51 = vmul.f32 %v667_v42, %v594_v37  ;;  %v526_v55 = vpop.f32.mrf.mxu2  ;;  %v658_v57 = vmul.f32 0.125, %v640_v44  ;;  %v604_v16 = vmul.f32 %v2347_v4, %v2347_v4  ;;  %v783_v18 = vsel %vm2385_vm12, %v2312_v3, %v779_v34 }
  0xf5   :  { %v716_v24 = vmul.f32 %v2370_v40, %v2370_v40  ;;  %v539_v6 = vpop.f32.mrf.mxu3  ;;  %v708_v42 = vmul.f32 %v692_v41, %v657_v63  ;;  %v581_v11 = vrot.slane %v580_v52, 1  ;;  %v644_v20 = vadd.f32 %v643_v1, %v642_v46 }
  0xf6   :  { %v717_v9 = vmul.f32 %v2377_v51, %v2377_v51  ;;  %v709_v22 = vmul.f32 %v693_v43, %v658_v57  ;;  %v586_v21 = vadd.f32 %v585_v5, %v584_v48  ;;  %v647_v29 = vrot.slane %v604_v16, 4 }
  0xf7   :  { %v724_v25 = vsub.f32 %v708_v42, %v716_v24  ;;  %v582_v28 = vadd.f32 %v581_v11, %v580_v52  ;;  %v1407_v41 = vcvt.s32.f32 %v1151_v7  ;;  %v645_v31 = vrot.slane %v644_v20, 1 }
  0xf8   :  { %v725_v30 = vsub.f32 %v709_v22, %v717_v9  ;;  %v587_v33 = vrot.slane %v586_v21, 1  ;;  %v1409_v13 = vcvt.s32.f32 %v1153_v17  ;;  %v834_v37 = vrot.slane %v783_v18, 5 }
  0xf9   :  { %v732_v38 = vmax.f32 %v724_v25, 0.0  ;;  %v595_v44 = vmul.f32 0.125, %v582_v28  ;;  %v648_v63 = vadd.f32 %v647_v29, %v604_v16  ;;  %v646_v34 = vadd.f32 %v645_v31, %v644_v20 }
  0xfa   :  { %v733_v3 = vmax.f32 %v725_v30, 0.0  ;;  %v588_v55 = vadd.f32 %v587_v33, %v586_v21  ;;  %v1601_v43 = vpack.c.bf16 %v1409_v13, %v1407_v41  ;;  %v1051_v7 = vunpack.c.0.s8 %v2265_v14 }
  0xfb   :  { %v2402_v46 = vadd.f32 1e-05, %v732_v38  ;;  %v2406_v48 = vmul.f32 %v668_v47, %v595_v44  ;;  %v649_v52 = vrot.slane %v648_v63, 2  ;;  %v659_v17 = vmul.f32 0.125, %v646_v34 }
  0xfc   :  { %v2409_v24 = vadd.f32 1e-05, %v733_v3  ;;  %v596_v57 = vmul.f32 0.125, %v588_v55  ;;  %1714 = vmatpush.bf16.msra.mxu3 %v1601_v43  ;;  %v1053_v1 = vunpack.c.1.s8 %v2265_v14  ;;  %v842_v47 = vsel %vm841_vm10, %v833_v45, %v834_v37  ;;  %v2458_v55 = vld [vmem:[#allocation6 + $0x60] sm:$0xff] }
  0xfd   :  { %2032 = vrsqrt.f32 %v2402_v46  ;;  %v718_v5 = vmul.f32 %v2406_v48, %v2406_v48  ;;  %v650_v6 = vadd.f32 %v649_v52, %v648_v63  ;;  %v710_v15 = vmul.f32 %v694_v54, %v659_v17  ;;  %v2453_v63 = vld [vmem:[#allocation6 + $0x20] sm:$0xff] }
  0xfe   :  { %2034 = vrsqrt.f32 %v2409_v24  ;;  %v2425_v14 = vmul.f32 %v669_v61, %v596_v57  ;;  %v753_v42 = vsel %vm752_vm14, %v2261_v12, %v2320_v8  ;;  %v1307_v11 = vcvt.s32.f32 %v1051_v7 }
  0xff   :  { %v651_v9 = vrot.slane %v650_v6, 1  ;;  %v1309_v16 = vcvt.s32.f32 %v1053_v1  ;;  %v840_v60 = vsel %vm839_vm11, %v753_v42, %v2351_v10  ;;  %v726_v18 = vsub.f32 %v710_v15, %v718_v5  ;;  %v2464_v15 = vld [vmem:[#allocation6 + $0xa0] sm:$0xff] }
 0x100   :  { %v1083_v45 = vunpack.c.0.s8 %v2272_v19  ;;  %v1085_v22 = vunpack.c.1.s8 %v2272_v19  ;;  %v2434_v54 = vsel %vm843_vm13, %v840_v60, %v842_v47  ;;  %v1115_v21 = vunpack.c.0.s8 %v2282_v26 }
 0x101   :  { %v652_v20 = vadd.f32 %v651_v9, %v650_v6  ;;  %v1551_v61 = vpack.c.bf16 %v1309_v16, %v1307_v11  ;;  %v734_v25 = vmax.f32 %v726_v18, 0.0  ;;  %v719_v12 = vmul.f32 %v2425_v14, %v2425_v14 }
 0x102   :  { %v1339_v8 = vcvt.s32.f32 %v1083_v45  ;;  %v1341_v28 = vcvt.s32.f32 %v1085_v22  ;;  %v1117_v41 = vunpack.c.1.s8 %v2282_v26  ;;  %v1371_v19 = vcvt.s32.f32 %v1115_v21 }
 0x103   :  { %v2439_v29 = vpop.eup %2032  ;;  %v660_v10 = vmul.f32 0.125, %v652_v20  ;;  %1676 = vmatpush.bf16.msra.mxu0 %v1551_v61  ;;  %v1147_v30 = vunpack.c.0.s8 %v2297_v50  ;;  %vm790_vm15 = vweird.f32 %v2402_v46  ;;  %v2446_v13 = vadd.f32 1e-05, %v734_v25 }
 0x104   :  { %v2035_v31 = vpop.eup %2034  ;;  %v785_v33 = vmul.f32 %v2439_v29, %v2402_v46  ;;  %v1567_v37 = vpack.c.bf16 %v1341_v28, %v1339_v8  ;;  %vm791_vm0 = vweird.f32 %v2439_v29  ;;  %vm800_vm1 = vweird.f32 %v2409_v24 }
 0x105   :  { %v795_v38 = vmul.f32 %v2035_v31, %v2409_v24  ;;  %v711_v26 = vmul.f32 %v695_v32, %v660_v10  ;;  %v1373_v44 = vcvt.s32.f32 %v1117_v41  ;;  %vm801_vm2 = vweird.f32 %v2035_v31  ;;  %vm792_vm4 = vmor %vm790_vm15, %vm791_vm0  ;;  %v991_v10 = vld [vmem:[#allocation6 + $0xe0] sm:$0xff] }
 0x106   :  { %v786_v3 = vmul.f32 %v2439_v29, %v785_v33  ;;  %2036 = vrsqrt.f32 %v2446_v13  ;;  %1689 = vmatpush.bf16.msra.mxu1 %v1567_v37  ;;  %v1149_v34 = vunpack.c.1.s8 %v2297_v50  ;;  %v1403_v17 = vcvt.s32.f32 %v1147_v30  ;;  %vm802_vm6 = vmor %vm800_vm1, %vm801_vm2 }
 0x107   :  { %v796_v43 = vmul.f32 %v2035_v31, %v795_v38  ;;  %v727_v52 = vsub.f32 %v711_v26, %v719_v12  ;;  %v1583_v7 = vpack.c.bf16 %v1373_v44, %v1371_v19  ;;  %v1047_v57 = vunpack.c.2.s8 %v2453_v63 }
 0x108   :  { %v787_v56 = vmul.f32 0.5, %v786_v3  ;;  %v1405_v32 = vcvt.s32.f32 %v1149_v34  ;;  %v1049_v1 = vunpack.c.3.s8 %v2453_v63  ;;  %v1079_v47 = vunpack.c.2.s8 %v2458_v55 }
 0x109   :  { %v797_v5 = vmul.f32 0.5, %v796_v43  ;;  %v735_v6 = vmax.f32 %v727_v52, 0.0  ;;  %1702 = vmatpush.bf16.msra.mxu2 %v1583_v7  ;;  %v1081_v50 = vunpack.c.3.s8 %v2458_v55  ;;  %v1303_v11 = vcvt.s32.f32 %v1047_v57 }
 0x10a   :  { %v788_v42 = vsub.f32 1.5, %v787_v56  ;;  %v1599_v9 = vpack.c.bf16 %v1405_v32, %v1403_v17  ;;  %v1305_v16 = vcvt.s32.f32 %v1049_v1  ;;  %v1335_v45 = vcvt.s32.f32 %v1079_v47 }
 0x10b   :  { %v798_v60 = vsub.f32 1.5, %v797_v5  ;;  %v2466_v18 = vadd.f32 1e-05, %v735_v6  ;;  %v1337_v22 = vcvt.s32.f32 %v1081_v50  ;;  %v1111_v25 = vunpack.c.2.s8 %v2464_v15 }
 0x10c   :  { %v2468_v20 = vpop.eup %2036  ;;  %v789_v61 = vmul.f32 %v2439_v29, %v788_v42  ;;  %1715 = vmatpush.bf16.msra.mxu3 %v1599_v9  ;;  %v1549_v21 = vpack.c.bf16 %v1305_v16, %v1303_v11  ;;  %v1113_v12 = vunpack.c.3.s8 %v2464_v15  ;;  %vm810_vm5 = vweird.f32 %v2446_v13  ;;  %v965_v42 = vld [vmem:[#allocation6 + $0x10] sm:$0xff] }
 0x10d   :  { %v799_v8 = vmul.f32 %v2035_v31, %v798_v60  ;;  %v805_v28 = vmul.f32 %v2468_v20, %v2446_v13  ;;  %2038 = vrsqrt.f32 %v2466_v18  ;;  %vm811_vm7 = vweird.f32 %v2468_v20 }
 0x10e   :  { %v793_v41 = vsel %vm792_vm4, %v2439_v29, %v789_v61  ;;  %1677 = vmatpush.bf16.msra.mxu0 %v1549_v21  ;;  %v1565_v46 = vpack.c.bf16 %v1337_v22, %v1335_v45  ;;  %v1367_v19 = vcvt.s32.f32 %v1111_v25  ;;  %v1369_v38 = vcvt.s32.f32 %v1113_v12  ;;  %vm812_vm12 = vmor %vm810_vm5, %vm811_vm7  ;;  %v973_v21 = vld [vmem:[#allocation6 + $0x50] sm:$0xff] }
 0x10f   :  { %v835_v30 = vrot.slane %v793_v41, 4  ;;  %v803_v33 = vsel %vm802_vm6, %v2035_v31, %v799_v8  ;;  %v806_v37 = vmul.f32 %v2468_v20, %v805_v28  ;;  %v1143_v44 = vunpack.c.2.s8 %v991_v10  ;;  %v981_v28 = vld [vmem:[#allocation6 + $0x90] sm:$0xff] }
 0x110   :  { %v836_v26 = vrot.slane %v803_v33, 3  ;;  %1690 = vmatpush.bf16.msra.mxu1 %v1565_v46  ;;  %v1145_v3 = vunpack.c.3.s8 %v991_v10  ;;  %v1043_v29 = vunpack.c.0.s8 %v2453_v63  ;;  %v1581_v43 = vpack.c.bf16 %v1369_v38, %v1367_v19 }
 0x111   :  { %v807_v34 = vmul.f32 0.5, %v806_v37  ;;  %v1045_v24 = vunpack.c.1.s8 %v2453_v63  ;;  %v1075_v52 = vunpack.c.0.s8 %v2458_v55  ;;  %v1399_v17 = vcvt.s32.f32 %v1143_v44 }
 0x112   :  { %v2491_v7 = vsel %vm845_vm3, %v835_v30, %v836_v26  ;;  %v1401_v31 = vcvt.s32.f32 %v1145_v3  ;;  %v1299_v56 = vcvt.s32.f32 %v1043_v29  ;;  %1703 = vmatpush.bf16.msra.mxu2 %v1581_v43  ;;  %v1077_v5 = vunpack.c.1.s8 %v2458_v55  ;;  %v989_v30 = vld [vmem:[#allocation6 + $0xd0] sm:$0xff] }
 0x113   :  { %v2493_v32 = vpop.eup %2038  ;;  %v808_v57 = vsub.f32 1.5, %v807_v34  ;;  %v1301_v1 = vcvt.s32.f32 %v1045_v24  ;;  %v1331_v6 = vcvt.s32.f32 %v1075_v52  ;;  %vm820_vm8 = vweird.f32 %v2466_v18 }
 0x114   :  { %v815_v47 = vmul.f32 %v2493_v32, %v2466_v18  ;;  %vm821_vm9 = vweird.f32 %v2493_v32  ;;  %v1597_v63 = vpack.c.bf16 %v1401_v31, %v1399_v17  ;;  %v1107_v50 = vunpack.c.0.s8 %v2464_v15 }
 0x115   :  { %v809_v9 = vmul.f32 %v2468_v20, %v808_v57  ;;  %v1547_v11 = vpack.c.bf16 %v1301_v1, %v1299_v56  ;;  %v1333_v16 = vcvt.s32.f32 %v1077_v5  ;;  %v1109_v60 = vunpack.c.1.s8 %v2464_v15  ;;  %vm822_vm1 = vmor %vm820_vm8, %vm821_vm9 }
 0x116   :  { %v816_v55 = vmul.f32 %v2493_v32, %v815_v47  ;;  %vm847_vm14 = vcmask 1046534   ;;  %1716 = vmatpush.bf16.msra.mxu3 %v1597_v63  ;;  %v1363_v45 = vcvt.s32.f32 %v1107_v50  ;;  %v1139_v22 = vunpack.c.0.s8 %v991_v10 }
 0x117   :  { %v1141_v61 = vunpack.c.1.s8 %v991_v10  ;;  %v813_v25 = vsel %vm812_vm12, %v2468_v20, %v809_v9  ;;  %vm849_vm15 = vcmask 1045508   ;;  %1678 = vmatpush.bf16.msra.mxu0 %v1547_v11  ;;  %v1563_v12 = vpack.c.bf16 %v1333_v16, %v1331_v6 }
 0x118   :  { %v1365_v8 = vcvt.s32.f32 %v1109_v60  ;;  %v1039_v15 = vunpack.c.2.s8 %v965_v42  ;;  %v837_v41 = vrot.slane %v813_v25, 2  ;;  %v817_v46 = vmul.f32 0.5, %v816_v55  ;;  %v78_v25 = vld [vmem:[#allocation7 + $0x8] sm:$0xff] }
 0x119   :  { %vm851_vm0 = vcmask 1043456   ;;  %v1395_v13 = vcvt.s32.f32 %v1139_v22  ;;  %v1397_v19 = vcvt.s32.f32 %v1141_v61  ;;  %1691 = vmatpush.bf16.msra.mxu1 %v1563_v12  ;;  %v1041_v37 = vunpack.c.3.s8 %v965_v42 }
 0x11a   :  { %v1579_v33 = vpack.c.bf16 %v1365_v8, %v1363_v45  ;;  %v1295_v38 = vcvt.s32.f32 %v1039_v15  ;;  %v1071_v10 = vunpack.c.2.s8 %v973_v21  ;;  %v818_v26 = vsub.f32 1.5, %v817_v46  ;;  %v2516_v46 = vld [vmem:[#allocation6] sm:$0xff] }
 0x11b   :  { %v1595_v44 = vpack.c.bf16 %v1397_v19, %v1395_v13  ;;  %v1073_v20 = vunpack.c.3.s8 %v973_v21  ;;  %v1103_v3 = vunpack.c.2.s8 %v981_v28  ;;  %v1297_v29 = vcvt.s32.f32 %v1041_v37  ;;  %v2520_v37 = vld [vmem:[#allocation6 + $0x40] sm:$0xff] }
 0x11c   :  { %1704 = vmatpush.bf16.msra.mxu2 %v1579_v33  ;;  %v1327_v34 = vcvt.s32.f32 %v1071_v10  ;;  %v1105_v43 = vunpack.c.3.s8 %v981_v28  ;;  %v1135_v24 = vunpack.c.2.s8 %v989_v30  ;;  %v819_v52 = vmul.f32 %v2493_v32, %v818_v26 }
 0x11d   :  { %1717 = vmatpush.bf16.msra.mxu3 %v1595_v44  ;;  %v1329_v17 = vcvt.s32.f32 %v1073_v20  ;;  %v1359_v31 = vcvt.s32.f32 %v1103_v3  ;;  %v1137_v56 = vunpack.c.3.s8 %v989_v30  ;;  %v1545_v57 = vpack.c.bf16 %v1297_v29, %v1295_v38 }
 0x11e   :  { %v1361_v1 = vcvt.s32.f32 %v1105_v43  ;;  %v1391_v5 = vcvt.s32.f32 %v1135_v24  ;;  %v1035_v6 = vunpack.c.0.s8 %v965_v42  ;;  %v823_v47 = vsel %vm822_vm1, %v2493_v32, %v819_v52 }
 0x11f   :  { %v1561_v63 = vpack.c.bf16 %v1329_v17, %v1327_v34  ;;  %v1393_v50 = vcvt.s32.f32 %v1137_v56  ;;  %v1037_v9 = vunpack.c.1.s8 %v965_v42  ;;  %v838_v11 = vrot.slane %v823_v47, 1  ;;  %1679 = vmatpush.bf16.msra.mxu0 %v1545_v57 }
 0x120   :  { %v1577_v16 = vpack.c.bf16 %v1361_v1, %v1359_v31  ;;  %v1291_v60 = vcvt.s32.f32 %v1035_v6  ;;  %v1067_v55 = vunpack.c.0.s8 %v973_v21  ;;  %v1069_v61 = vunpack.c.1.s8 %v973_v21 }
 0x121   :  { %1692 = vmatpush.bf16.msra.mxu1 %v1561_v63  ;;  %v1593_v45 = vpack.c.bf16 %v1393_v50, %v1391_v5  ;;  %v1293_v22 = vcvt.s32.f32 %v1037_v9  ;;  %v1099_v18 = vunpack.c.0.s8 %v981_v28  ;;  %v848_v12 = vsel %vm847_vm14, %v837_v41, %v838_v11 }
 0x122   :  { %1705 = vmatpush.bf16.msra.mxu2 %v1577_v16  ;;  %v1323_v8 = vcvt.s32.f32 %v1067_v55  ;;  %v1101_v15 = vunpack.c.1.s8 %v981_v28  ;;  %v1131_v32 = vunpack.c.0.s8 %v989_v30  ;;  %v850_v42 = vsel %vm849_vm15, %v2491_v7, %v848_v12  ;;  %v79_v12 = vld [vmem:[#allocation7 + $0x10] sm:$0xff] }
 0x123   :  { %1718 = vmatpush.bf16.msra.mxu3 %v1593_v45  ;;  %v1543_v13 = vpack.c.bf16 %v1293_v22, %v1291_v60  ;;  %v1325_v19 = vcvt.s32.f32 %v1069_v61  ;;  %v1355_v33 = vcvt.s32.f32 %v1099_v18  ;;  %v852_v21 = vsel %vm851_vm0, %v2434_v54, %v850_v42  ;;  %v979_v18 = vld [vmem:[#allocation6 + $0x80] sm:$0xff] }
 0x124   :  { %v1357_v38 = vcvt.s32.f32 %v1101_v15  ;;  %v1133_v41 = vunpack.c.1.s8 %v989_v30  ;;  %v1387_v10 = vcvt.s32.f32 %v1131_v32  ;;  %v854_v26 = vmul.f32 %v852_v21, %v78_v25 }
 0x125   :  { %1680 = vmatpush.bf16.msra.mxu0 %v1543_v13  ;;  %v1559_v28 = vpack.c.bf16 %v1325_v19, %v1323_v8  ;;  %v1031_v44 = vunpack.c.2.s8 %v2516_v46  ;;  %v1033_v20 = vunpack.c.3.s8 %v2516_v46  ;;  %v1063_v29 = vunpack.c.2.s8 %v2520_v37 }
 0x126   :  { %v1575_v7 = vpack.c.bf16 %v1357_v38, %v1355_v33  ;;  %v1389_v3 = vcvt.s32.f32 %v1133_v41  ;;  %v1065_v34 = vunpack.c.3.s8 %v2520_v37  ;;  %v2529_v43 = vmul.f32 %v854_v26, %v2203_v36 }
 0x127   :  { %v882_v54 = vperm.slane %v854_v26, 0  ;;  %v883_v24 = vperm.slane %v854_v26, 1  ;;  %v884_v30 = vperm.slane %v854_v26, 2  ;;  %1693 = vmatpush.bf16.msra.mxu1 %v1559_v28  ;;  %v885_v52 = vperm.slane %v854_v26, 3 }
 0x128   :  { %v886_v17 = vperm.slane %v854_v26, 4  ;;  %v887_v31 = vperm.slane %v854_v26, 5  ;;  %v888_v56 = vperm.slane %v854_v26, 6  ;;  %1706 = vmatpush.bf16.msra.mxu2 %v1575_v7  ;;  %v864_v57 = vperm.slane %v2529_v43, 7 }
 0x129   :  { %v889_v1 = vperm.slane %v854_v26, 7  ;;  %v898_v5 = vmul.f32 %v882_v54, %v2235_v23  ;;  %v899_v6 = vmul.f32 %v883_v24, %v2237_v27  ;;  %v900_v47 = vmul.f32 %v884_v30, %v2248_v62 }
 0x12a   :  { %v901_v36 = vmul.f32 %v885_v52, %v2252_v2  ;;  %v902_v63 = vmul.f32 %v886_v17, %v2370_v40  ;;  %v903_v50 = vmul.f32 %v887_v31, %v2377_v51  ;;  %v880_v9 = vmul.f32 %v864_v57, %v2347_v4  ;;  %v1001_v17 = vld [vmem:[#allocation6 + $0x130] sm:$0xff] }
 0x12b   :  { %v904_v11 = vmul.f32 %v888_v56, %v2406_v48  ;;  %v905_v16 = vmul.f32 %v889_v1, %v2425_v14  ;;  %v914_v60 = vrot.slane %v899_v6, 7  ;;  %v915_v55 = vrot.slane %v900_v47, 6  ;;  %v987_v48 = vld [vmem:[#allocation6 + $0xc0] sm:$0xff] }
 0x12c   :  { %v916_v45 = vrot.slane %v901_v36, 5  ;;  %v917_v23 = vrot.slane %v902_v63, 4  ;;  %v918_v22 = vrot.slane %v903_v50, 3  ;;  %v1591_v2 = vpack.c.bf16 %v1389_v3, %v1387_v10 }
 0x12d   :  { %v919_v27 = vrot.slane %v904_v11, 2  ;;  %v920_v61 = vrot.slane %v905_v16, 1  ;;  %v921_v62 = vsel %vm839_vm11, %v898_v5, %v914_v60  ;;  %v1287_v4 = vcvt.s32.f32 %v1031_v44  ;;  %v1017_v60 = vld [vmem:[#allocation6 + $0x1b0] sm:$0xff] }
 0x12e   :  { %v922_v40 = vsel %vm841_vm10, %v915_v55, %v916_v45  ;;  %v924_v51 = vsel %vm845_vm3, %v917_v23, %v918_v22  ;;  %v1289_v25 = vcvt.s32.f32 %v1033_v20  ;;  %1719 = vmatpush.bf16.msra.mxu3 %v1591_v2  ;;  %v1319_v15 = vcvt.s32.f32 %v1063_v29  ;;  %v1025_v22 = vld [vmem:[#allocation6 + $0x1f0] sm:$0xff] }
 0x12f   :  { %v923_v14 = vsel %vm843_vm13, %v921_v62, %v922_v40  ;;  %v925_v8 = vsel %vm847_vm14, %v919_v27, %v920_v61  ;;  %v1321_v32 = vcvt.s32.f32 %v1065_v34  ;;  %v1095_v19 = vunpack.c.2.s8 %v979_v18 }
 0x130   :  { %v926_v42 = vsel %vm849_vm15, %v924_v51, %v925_v8  ;;  %v1541_v13 = vpack.c.bf16 %v1289_v25, %v1287_v4  ;;  %v1097_v33 = vunpack.c.3.s8 %v979_v18  ;;  %v1127_v41 = vunpack.c.2.s8 %v987_v48 }
 0x131   :  { %v927_v21 = vsel %vm851_vm0, %v923_v14, %v926_v42  ;;  %v1557_v38 = vpack.c.bf16 %v1321_v32, %v1319_v15  ;;  %v1129_v10 = vunpack.c.3.s8 %v987_v48  ;;  %v1351_v28 = vcvt.s32.f32 %v1095_v19 }
 0x132   :  { %v2548_v26 = vsub.f32 %v79_v12, %v927_v21  ;;  %1681 = vmatpush.bf16.msra.mxu0 %v1541_v13  ;;  %v1353_v44 = vcvt.s32.f32 %v1097_v33  ;;  %v1027_v20 = vunpack.c.0.s8 %v2516_v46  ;;  %v1383_v7 = vcvt.s32.f32 %v1127_v41 }
 0x133   :  { %1694 = vmatpush.bf16.msra.mxu1 %v1557_v38  ;;  %v1385_v3 = vcvt.s32.f32 %v1129_v10  ;;  %v1029_v29 = vunpack.c.1.s8 %v2516_v46  ;;  %v1059_v34 = vunpack.c.0.s8 %v2520_v37  ;;  %v1061_v52 = vunpack.c.1.s8 %v2520_v37  ;;  %v1009_v46 = vld [vmem:[#allocation6 + $0x170] sm:$0xff] }
 0x134   :  { %v938_v54 = vperm.slane %v2548_v26, 7  ;;  %v1573_v24 = vpack.c.bf16 %v1353_v44, %v1351_v28  ;;  %v1283_v30 = vcvt.s32.f32 %v1027_v20  ;;  %v1091_v1 = vunpack.c.0.s8 %v979_v18 }
 0x135   :  { %v1589_v31 = vpack.c.bf16 %v1385_v3, %v1383_v7  ;;  %v1285_v56 = vcvt.s32.f32 %v1029_v29  ;;  %v1315_v57 = vcvt.s32.f32 %v1059_v34  ;;  %v1317_v6 = vcvt.s32.f32 %v1061_v52  ;;  %v999_v3 = vld [vmem:[#allocation6 + $0x120] sm:$0xff] }
 0x136   :  { %v2555_v5 = vadd.f32 %v938_v54, %v880_v9  ;;  %1707 = vmatpush.bf16.msra.mxu2 %v1573_v24  ;;  %v1093_v47 = vunpack.c.1.s8 %v979_v18  ;;  %v1123_v36 = vunpack.c.0.s8 %v987_v48  ;;  %v1347_v50 = vcvt.s32.f32 %v1091_v1 }
 0x137   :  { %1720 = vmatpush.bf16.msra.mxu3 %v1589_v31  ;;  %v1539_v63 = vpack.c.bf16 %v1285_v56, %v1283_v30  ;;  %v1125_v11 = vunpack.c.1.s8 %v987_v48  ;;  %v1183_v16 = vunpack.c.2.s8 %v1001_v17  ;;  %v1555_v55 = vpack.c.bf16 %v1317_v6, %v1315_v57  ;;  %v1007_v30 = vld [vmem:[#allocation6 + $0x160] sm:$0xff] }
 0x138   :  { %v1349_v37 = vcvt.s32.f32 %v1093_v47  ;;  %v1379_v45 = vcvt.s32.f32 %v1123_v36  ;;  %v1185_v23 = vunpack.c.3.s8 %v1001_v17  ;;  %v1215_v61 = vunpack.c.2.s8 %v1009_v46  ;;  %v1015_v57 = vld [vmem:[#allocation6 + $0x1a0] sm:$0xff] }
 0x139   :  { %1682 = vmatpush.bf16.msra.mxu0 %v1539_v63  ;;  %v1381_v27 = vcvt.s32.f32 %v1125_v11  ;;  %v1439_v9 = vcvt.s32.f32 %v1183_v16  ;;  %v1217_v62 = vunpack.c.3.s8 %v1009_v46  ;;  %1695 = vmatpush.bf16.msra.mxu1 %v1555_v55  ;;  %v1247_v40 = vunpack.c.2.s8 %v1017_v60 }
 0x13a   :  { %v1571_v2 = vpack.c.bf16 %v1349_v37, %v1347_v50  ;;  %v1441_v18 = vcvt.s32.f32 %v1185_v23  ;;  %v1249_v51 = vunpack.c.3.s8 %v1017_v60  ;;  %v1471_v25 = vcvt.s32.f32 %v1215_v61 }
 0x13b   :  { %v1587_v4 = vpack.c.bf16 %v1381_v27, %v1379_v45  ;;  %v1473_v48 = vcvt.s32.f32 %v1217_v62  ;;  %v1279_v12 = vunpack.c.2.s8 %v1025_v22  ;;  %v1503_v8 = vcvt.s32.f32 %v1247_v40 }
 0x13c   :  { %1708 = vmatpush.bf16.msra.mxu2 %v1571_v2  ;;  %v1617_v14 = vpack.c.bf16 %v1441_v18, %v1439_v9  ;;  %v1505_v15 = vcvt.s32.f32 %v1249_v51  ;;  %v1281_v32 = vunpack.c.3.s8 %v1025_v22  ;;  %v1179_v19 = vunpack.c.0.s8 %v1001_v17 }
 0x13d   :  { %1721 = vmatpush.bf16.msra.mxu3 %v1587_v4  ;;  %v1633_v42 = vpack.c.bf16 %v1473_v48, %v1471_v25  ;;  %v1535_v13 = vcvt.s32.f32 %v1279_v12  ;;  %v1181_v33 = vunpack.c.1.s8 %v1001_v17  ;;  %v1211_v41 = vunpack.c.0.s8 %v1009_v46 }
 0x13e   :  { %1727 = vmatpush.bf16.msrb.mxu0 %v1617_v14  ;;  %v1649_v21 = vpack.c.bf16 %v1505_v15, %v1503_v8  ;;  %v1537_v38 = vcvt.s32.f32 %v1281_v32  ;;  %v1213_v10 = vunpack.c.1.s8 %v1009_v46  ;;  %v1435_v28 = vcvt.s32.f32 %v1179_v19  ;;  %v1023_v46 = vld [vmem:[#allocation6 + $0x1e0] sm:$0xff]  ;;  %v997_v19 = vld [vmem:[#allocation6 + $0x110] sm:$0xff] }
 0x13f   :  { %1740 = vmatpush.bf16.msrb.mxu1 %v1633_v42  ;;  %v1437_v44 = vcvt.s32.f32 %v1181_v33  ;;  %v1243_v20 = vunpack.c.0.s8 %v1017_v60  ;;  %v1245_v7 = vunpack.c.1.s8 %v1017_v60  ;;  %v1467_v34 = vcvt.s32.f32 %v1211_v41 }
 0x140   :  { %1753 = vmatpush.bf16.msrb.mxu2 %v1649_v21  ;;  %v1665_v29 = vpack.c.bf16 %v1537_v38, %v1535_v13  ;;  %v1469_v54 = vcvt.s32.f32 %v1213_v10  ;;  %v1275_v24 = vunpack.c.0.s8 %v1025_v22  ;;  %v1277_v56 = vunpack.c.1.s8 %v1025_v22  ;;  %v1005_v10 = vld [vmem:[#allocation6 + $0x150] sm:$0xff] }
 0x141   :  { %v1615_v52 = vpack.c.bf16 %v1437_v44, %v1435_v28  ;;  %v1499_v31 = vcvt.s32.f32 %v1243_v20  ;;  %v1501_v17 = vcvt.s32.f32 %v1245_v7  ;;  %v1175_v47 = vunpack.c.2.s8 %v999_v3 }
 0x142   :  { %1766 = vmatpush.bf16.msrb.mxu3 %v1665_v29  ;;  %v1631_v1 = vpack.c.bf16 %v1469_v54, %v1467_v34  ;;  %v1531_v6 = vcvt.s32.f32 %v1275_v24  ;;  %v1177_v36 = vunpack.c.3.s8 %v999_v3  ;;  %v1533_v50 = vcvt.s32.f32 %v1277_v56 }
 0x143   :  { %1728 = vmatpush.bf16.msrb.mxu0 %v1615_v52  ;;  %v1647_v63 = vpack.c.bf16 %v1501_v17, %v1499_v31  ;;  %v1207_v11 = vunpack.c.2.s8 %v1007_v30  ;;  %v1209_v16 = vunpack.c.3.s8 %v1007_v30  ;;  %v1431_v60 = vcvt.s32.f32 %v1175_v47 }
 0x144   :  { %1741 = vmatpush.bf16.msrb.mxu1 %v1631_v1  ;;  %v1433_v55 = vcvt.s32.f32 %v1177_v36  ;;  %v1239_v37 = vunpack.c.2.s8 %v1015_v57  ;;  %v1241_v45 = vunpack.c.3.s8 %v1015_v57  ;;  %v1663_v23 = vpack.c.bf16 %v1533_v50, %v1531_v6 }
 0x145   :  { %1754 = vmatpush.bf16.msrb.mxu2 %v1647_v63  ;;  %v1463_v22 = vcvt.s32.f32 %v1207_v11  ;;  %v1465_v27 = vcvt.s32.f32 %v1209_v16  ;;  %v1271_v9 = vunpack.c.2.s8 %v1023_v46  ;;  %v1273_v18 = vunpack.c.3.s8 %v1023_v46 }
 0x146   :  { %v1613_v61 = vpack.c.bf16 %v1433_v55, %v1431_v60  ;;  %v1495_v62 = vcvt.s32.f32 %v1239_v37  ;;  %v1497_v2 = vcvt.s32.f32 %v1241_v45  ;;  %1767 = vmatpush.bf16.msrb.mxu3 %v1663_v23  ;;  %v1171_v4 = vunpack.c.0.s8 %v999_v3 }
 0x147   :  { %v1629_v40 = vpack.c.bf16 %v1465_v27, %v1463_v22  ;;  %v1527_v51 = vcvt.s32.f32 %v1271_v9  ;;  %v1173_v25 = vunpack.c.1.s8 %v999_v3  ;;  %v1529_v12 = vcvt.s32.f32 %v1273_v18  ;;  %v1013_v3 = vld [vmem:[#allocation6 + $0x190] sm:$0xff] }
 0x148   :  { %1729 = vmatpush.bf16.msrb.mxu0 %v1613_v61  ;;  %v1645_v48 = vpack.c.bf16 %v1497_v2, %v1495_v62  ;;  %v1203_v14 = vunpack.c.0.s8 %v1007_v30  ;;  %v1205_v8 = vunpack.c.1.s8 %v1007_v30  ;;  %v1427_v15 = vcvt.s32.f32 %v1171_v4  ;;  %v1021_v30 = vld [vmem:[#allocation6 + $0x1d0] sm:$0xff]  ;;  %v995_v4 = vld [vmem:[#allocation6 + $0x100] sm:$0xff] }
 0x149   :  { %1742 = vmatpush.bf16.msrb.mxu1 %v1629_v40  ;;  %v1429_v32 = vcvt.s32.f32 %v1173_v25  ;;  %v1235_v42 = vunpack.c.0.s8 %v1015_v57  ;;  %v1237_v13 = vunpack.c.1.s8 %v1015_v57  ;;  %v1661_v33 = vpack.c.bf16 %v1529_v12, %v1527_v51 }
 0x14a   :  { %1755 = vmatpush.bf16.msrb.mxu2 %v1645_v48  ;;  %v1459_v21 = vcvt.s32.f32 %v1203_v14  ;;  %v1461_v38 = vcvt.s32.f32 %v1205_v8  ;;  %v1267_v41 = vunpack.c.0.s8 %v1023_v46  ;;  %v1269_v7 = vunpack.c.1.s8 %v1023_v46  ;;  %v1003_v8 = vld [vmem:[#allocation6 + $0x140] sm:$0xff] }
 0x14b   :  { %v1611_v28 = vpack.c.bf16 %v1429_v32, %v1427_v15  ;;  %v1491_v44 = vcvt.s32.f32 %v1235_v42  ;;  %v1493_v20 = vcvt.s32.f32 %v1237_v13  ;;  %1768 = vmatpush.bf16.msrb.mxu3 %v1661_v33  ;;  %v1167_v54 = vunpack.c.2.s8 %v997_v19 }
 0x14c   :  { %v1627_v29 = vpack.c.bf16 %v1461_v38, %v1459_v21  ;;  %v1523_v34 = vcvt.s32.f32 %v1267_v41  ;;  %v1169_v24 = vunpack.c.3.s8 %v997_v19  ;;  %v1525_v31 = vcvt.s32.f32 %v1269_v7 }
 0x14d   :  { %1730 = vmatpush.bf16.msrb.mxu0 %v1611_v28  ;;  %v1643_v52 = vpack.c.bf16 %v1493_v20, %v1491_v44  ;;  %v1199_v17 = vunpack.c.2.s8 %v1005_v10  ;;  %v1201_v56 = vunpack.c.3.s8 %v1005_v10  ;;  %v1423_v57 = vcvt.s32.f32 %v1167_v54 }
 0x14e   :  { %1743 = vmatpush.bf16.msrb.mxu1 %v1627_v29  ;;  %v1425_v1 = vcvt.s32.f32 %v1169_v24  ;;  %v1231_v6 = vunpack.c.2.s8 %v1013_v3  ;;  %v1233_v47 = vunpack.c.3.s8 %v1013_v3  ;;  %v1659_v36 = vpack.c.bf16 %v1525_v31, %v1523_v34 }
 0x14f   :  { %1756 = vmatpush.bf16.msrb.mxu2 %v1643_v52  ;;  %v1455_v46 = vcvt.s32.f32 %v1199_v17  ;;  %v1457_v63 = vcvt.s32.f32 %v1201_v56  ;;  %v1263_v50 = vunpack.c.2.s8 %v1021_v30  ;;  %v1265_v55 = vunpack.c.3.s8 %v1021_v30 }
 0x150   :  { %v1609_v11 = vpack.c.bf16 %v1425_v1, %v1423_v57  ;;  %v1487_v16 = vcvt.s32.f32 %v1231_v6  ;;  %v1489_v60 = vcvt.s32.f32 %v1233_v47  ;;  %1769 = vmatpush.bf16.msrb.mxu3 %v1659_v36  ;;  %v1163_v23 = vunpack.c.0.s8 %v997_v19 }
 0x151   :  { %v1625_v37 = vpack.c.bf16 %v1457_v63, %v1455_v46  ;;  %v1519_v45 = vcvt.s32.f32 %v1263_v50  ;;  %v1165_v22 = vunpack.c.1.s8 %v997_v19  ;;  %v1521_v9 = vcvt.s32.f32 %v1265_v55  ;;  %v1011_v19 = vld [vmem:[#allocation6 + $0x180] sm:$0xff] }
 0x152   :  { %1731 = vmatpush.bf16.msrb.mxu0 %v1609_v11  ;;  %v1641_v27 = vpack.c.bf16 %v1489_v60, %v1487_v16  ;;  %v1195_v61 = vunpack.c.0.s8 %v1005_v10  ;;  %v1197_v62 = vunpack.c.1.s8 %v1005_v10  ;;  %v1419_v2 = vcvt.s32.f32 %v1163_v23  ;;  %v1019_v10 = vld [vmem:[#allocation6 + $0x1c0] sm:$0xff] }
 0x153   :  { %1744 = vmatpush.bf16.msrb.mxu1 %v1625_v37  ;;  %v1421_v18 = vcvt.s32.f32 %v1165_v22  ;;  %v1227_v40 = vunpack.c.0.s8 %v1013_v3  ;;  %v1229_v51 = vunpack.c.1.s8 %v1013_v3  ;;  %v1657_v25 = vpack.c.bf16 %v1521_v9, %v1519_v45 }
 0x154   :  { %1757 = vmatpush.bf16.msrb.mxu2 %v1641_v27  ;;  %v1451_v48 = vcvt.s32.f32 %v1195_v61  ;;  %v1453_v12 = vcvt.s32.f32 %v1197_v62  ;;  %v1259_v14 = vunpack.c.0.s8 %v1021_v30  ;;  %v1261_v13 = vunpack.c.1.s8 %v1021_v30 }
 0x155   :  { %v1607_v15 = vpack.c.bf16 %v1421_v18, %v1419_v2  ;;  %v1483_v32 = vcvt.s32.f32 %v1227_v40  ;;  %v1485_v42 = vcvt.s32.f32 %v1229_v51  ;;  %1770 = vmatpush.bf16.msrb.mxu3 %v1657_v25  ;;  %v1159_v38 = vunpack.c.2.s8 %v995_v4 }
 0x156   :  { %v1623_v33 = vpack.c.bf16 %v1453_v12, %v1451_v48  ;;  %v1515_v21 = vcvt.s32.f32 %v1259_v14  ;;  %v1161_v41 = vunpack.c.3.s8 %v995_v4  ;;  %v1517_v44 = vcvt.s32.f32 %v1261_v13  ;;  %v2559_v48 = vld [vmem:[#allocation6 + $0x38] sm:$0xff] }
 0x157   :  { %1732 = vmatpush.bf16.msrb.mxu0 %v1607_v15  ;;  %v1639_v28 = vpack.c.bf16 %v1485_v42, %v1483_v32  ;;  %v1191_v20 = vunpack.c.2.s8 %v1003_v8  ;;  %v1193_v7 = vunpack.c.3.s8 %v1003_v8  ;;  %v1415_v3 = vcvt.s32.f32 %v1159_v38 }
 0x158   :  { %1745 = vmatpush.bf16.msrb.mxu1 %v1623_v33  ;;  %v1417_v29 = vcvt.s32.f32 %v1161_v41  ;;  %v1223_v34 = vunpack.c.2.s8 %v1011_v19  ;;  %v1225_v54 = vunpack.c.3.s8 %v1011_v19  ;;  %v1655_v24 = vpack.c.bf16 %v1517_v44, %v1515_v21  ;;  %v978_v33 = vld [vmem:[#allocation6 + $0x78] sm:$0xff] }
 0x159   :  { %1758 = vmatpush.bf16.msrb.mxu2 %v1639_v28  ;;  %v1447_v30 = vcvt.s32.f32 %v1191_v20  ;;  %v1449_v52 = vcvt.s32.f32 %v1193_v7  ;;  %v1255_v31 = vunpack.c.2.s8 %v1019_v10  ;;  %v1257_v1 = vunpack.c.3.s8 %v1019_v10  ;;  %v986_v7 = vld [vmem:[#allocation6 + $0xb8] sm:$0xff] }
 0x15a   :  { %v1605_v17 = vpack.c.bf16 %v1417_v29, %v1415_v3  ;;  %v1479_v56 = vcvt.s32.f32 %v1223_v34  ;;  %v1481_v57 = vcvt.s32.f32 %v1225_v54  ;;  %1771 = vmatpush.bf16.msrb.mxu3 %v1655_v24  ;;  %v1155_v36 = vunpack.c.0.s8 %v995_v4 }
 0x15b   :  { %v1621_v6 = vpack.c.bf16 %v1449_v52, %v1447_v30  ;;  %v1511_v47 = vcvt.s32.f32 %v1255_v31  ;;  %v1157_v46 = vunpack.c.1.s8 %v995_v4  ;;  %v1513_v50 = vcvt.s32.f32 %v1257_v1  ;;  %v994_v1 = vld [vmem:[#allocation6 + $0xf8] sm:$0xff] }
 0x15c   :  { %1733 = vmatpush.bf16.msrb.mxu0 %v1605_v17  ;;  %v1637_v63 = vpack.c.bf16 %v1481_v57, %v1479_v56  ;;  %v1187_v11 = vunpack.c.0.s8 %v1003_v8  ;;  %v1189_v16 = vunpack.c.1.s8 %v1003_v8  ;;  %v1411_v60 = vcvt.s32.f32 %v1155_v36 }
 0x15d   :  { %1746 = vmatpush.bf16.msrb.mxu1 %v1621_v6  ;;  %v1413_v55 = vcvt.s32.f32 %v1157_v46  ;;  %v1219_v37 = vunpack.c.0.s8 %v1011_v19  ;;  %v1221_v45 = vunpack.c.1.s8 %v1011_v19  ;;  %v1653_v23 = vpack.c.bf16 %v1513_v50, %v1511_v47 }
 0x15e   :  { %1759 = vmatpush.bf16.msrb.mxu2 %v1637_v63  ;;  %v1443_v22 = vcvt.s32.f32 %v1187_v11  ;;  %v1445_v27 = vcvt.s32.f32 %v1189_v16  ;;  %v1251_v9 = vunpack.c.0.s8 %v1019_v10  ;;  %v1253_v18 = vunpack.c.1.s8 %v1019_v10 }
 0x15f   :  { %v1603_v61 = vpack.c.bf16 %v1413_v55, %v1411_v60  ;;  %v1475_v62 = vcvt.s32.f32 %v1219_v37  ;;  %v1477_v2 = vcvt.s32.f32 %v1221_v45  ;;  %1772 = vmatpush.bf16.msrb.mxu3 %v1653_v23  ;;  %v857_v4 = vperm.slane %v2529_v43, 0 }
 0x160   :  { %v1619_v40 = vpack.c.bf16 %v1445_v27, %v1443_v22  ;;  %v1507_v51 = vcvt.s32.f32 %v1251_v9  ;;  %v931_v25 = vperm.slane %v2548_v26, 0  ;;  %v1509_v14 = vcvt.s32.f32 %v1253_v18 }
 0x161   :  { %1734 = vmatpush.bf16.msrb.mxu0 %v1603_v61  ;;  %v1635_v12 = vpack.c.bf16 %v1477_v2, %v1475_v62  ;;  %v858_v8 = vperm.slane %v2529_v43, 1  ;;  %v932_v15 = vperm.slane %v2548_v26, 1  ;;  %v873_v32 = vmul.f32 %v857_v4, %v2201_v35  ;;  %v968_v2 = vld [vmem:[#allocation6 + $0x28] sm:$0xff] }
 0x162   :  { %1747 = vmatpush.bf16.msrb.mxu1 %v1619_v40  ;;  %v859_v42 = vperm.slane %v2529_v43, 2  ;;  %v933_v13 = vperm.slane %v2548_v26, 2  ;;  %v860_v19 = vperm.slane %v2529_v43, 3  ;;  %v1651_v21 = vpack.c.bf16 %v1509_v14, %v1507_v51 }
 0x163   :  { %1760 = vmatpush.bf16.msrb.mxu2 %v1635_v12  ;;  %v874_v38 = vmul.f32 %v858_v8, %v2208_v39  ;;  %v934_v41 = vperm.slane %v2548_v26, 3  ;;  %v1056_v10 = vunpack.c.2.s8 %v2559_v48  ;;  %v947_v28 = vadd.f32 %v931_v25, %v873_v32  ;;  %v976_v25 = vld [vmem:[#allocation6 + $0x68] sm:$0xff] }
 0x164   :  { %v875_v44 = vmul.f32 %v859_v42, %v2222_v58  ;;  %v876_v35 = vmul.f32 %v860_v19, %v2227_v0  ;;  %v1058_v20 = vunpack.c.3.s8 %v2559_v48  ;;  %1773 = vmatpush.bf16.msrb.mxu3 %v1651_v21  ;;  %v1088_v34 = vunpack.c.2.s8 %v978_v33  ;;  %v984_v19 = vld [vmem:[#allocation6 + $0xa8] sm:$0xff] }
 0x165   :  { %v948_v3 = vadd.f32 %v932_v15, %v874_v38  ;;  %v1312_v29 = vcvt.s32.f32 %v1056_v10  ;;  %v1090_v54 = vunpack.c.3.s8 %v978_v33  ;;  %v955_v24 = vmax.f32 %v947_v28, 0.0  ;;  %v992_v10 = vld [vmem:[#allocation6 + $0xe8] sm:$0xff] }
 0x166   :  { %v949_v30 = vadd.f32 %v933_v13, %v875_v44  ;;  %v950_v39 = vadd.f32 %v934_v41, %v876_v35  ;;  %v1314_v52 = vcvt.s32.f32 %v1058_v20  ;;  %v1344_v17 = vcvt.s32.f32 %v1088_v34 }
 0x167   :  { %v956_v31 = vmax.f32 %v948_v3, 0.0  ;;  %v1346_v56 = vcvt.s32.f32 %v1090_v54  ;;  %v1120_v57 = vunpack.c.2.s8 %v986_v7  ;;  %v2573_v58 = vpack.c.bf16 %v955_v24, %v955_v24 }
 0x168   :  { %v957_v0 = vmax.f32 %v949_v30, 0.0  ;;  %v958_v6 = vmax.f32 %v950_v39, 0.0  ;;  %v1554_v47 = vpack.c.bf16 %v1314_v52, %v1312_v29  ;;  %v1122_v63 = vunpack.c.3.s8 %v986_v7 }
 0x169   :  { %v2575_v36 = vpack.c.bf16 %v956_v31, %v956_v31  ;;  %v1570_v46 = vpack.c.bf16 %v1346_v56, %v1344_v17  ;;  %v1376_v50 = vcvt.s32.f32 %v1120_v57  ;;  %1683 = vmatmul.bf16.vlgmr.msra.gmra.mxu0 %v2573_v58  ;;  %v1152_v60 = vunpack.c.2.s8 %v994_v1 }
 0x16a   :  { %v2578_v11 = vpack.c.bf16 %v957_v0, %v957_v0  ;;  %v2580_v16 = vpack.c.bf16 %v958_v6, %v958_v6  ;;  %v1154_v55 = vunpack.c.3.s8 %v994_v1  ;;  %1779 = vmatpush.bf16.msra.mxu0 %v1554_v47  ;;  %v1378_v37 = vcvt.s32.f32 %v1122_v63 }
 0x16b   :  { %1696 = vmatmul.bf16.vlgmr.msra.gmra.mxu1 %v2575_v36  ;;  %v1052_v45 = vunpack.c.0.s8 %v2559_v48  ;;  %v1054_v23 = vunpack.c.1.s8 %v2559_v48  ;;  %v1084_v22 = vunpack.c.0.s8 %v978_v33  ;;  %v1408_v27 = vcvt.s32.f32 %v1152_v60 }
 0x16c   :  { %1709 = vmatmul.bf16.vlgmr.msra.gmra.mxu2 %v2578_v11  ;;  %1722 = vmatmul.bf16.vlgmr.msra.gmra.mxu3 %v2580_v16  ;;  %v1410_v9 = vcvt.s32.f32 %v1154_v55  ;;  %v1086_v61 = vunpack.c.1.s8 %v978_v33  ;;  %v1116_v62 = vunpack.c.0.s8 %v986_v7  ;;  %v1586_v18 = vpack.c.bf16 %v1378_v37, %v1376_v50 }
 0x16d   :  { %1792 = vmatpush.bf16.msra.mxu1 %v1570_v46  ;;  %v1308_v40 = vcvt.s32.f32 %v1052_v45  ;;  %v1310_v51 = vcvt.s32.f32 %v1054_v23  ;;  %v1340_v4 = vcvt.s32.f32 %v1084_v22  ;;  %v1118_v8 = vunpack.c.1.s8 %v986_v7 }
 0x16e   :  { %v1602_v12 = vpack.c.bf16 %v1410_v9, %v1408_v27  ;;  %v1342_v14 = vcvt.s32.f32 %v1086_v61  ;;  %v1372_v48 = vcvt.s32.f32 %v1116_v62  ;;  %1805 = vmatpush.bf16.msra.mxu2 %v1586_v18  ;;  %v1148_v32 = vunpack.c.0.s8 %v994_v1 }
 0x16f   :  { %v1552_v15 = vpack.c.bf16 %v1310_v51, %v1308_v40  ;;  %v1150_v42 = vunpack.c.1.s8 %v994_v1  ;;  %v1048_v13 = vunpack.c.2.s8 %v968_v2  ;;  %v1374_v21 = vcvt.s32.f32 %v1118_v8 }
 0x170   :  { %1818 = vmatpush.bf16.msra.mxu3 %v1602_v12  ;;  %v1568_v33 = vpack.c.bf16 %v1342_v14, %v1340_v4  ;;  %v1050_v38 = vunpack.c.3.s8 %v968_v2  ;;  %v1080_v41 = vunpack.c.2.s8 %v976_v25  ;;  %v1404_v28 = vcvt.s32.f32 %v1148_v32  ;;  %v966_v12 = vld [vmem:[#allocation6 + $0x18] sm:$0xff] }
 0x171   :  { %1780 = vmatpush.bf16.msra.mxu0 %v1552_v15  ;;  %v1406_v44 = vcvt.s32.f32 %v1150_v42  ;;  %v1304_v35 = vcvt.s32.f32 %v1048_v13  ;;  %v1082_v20 = vunpack.c.3.s8 %v976_v25  ;;  %v1584_v7 = vpack.c.bf16 %v1374_v21, %v1372_v48  ;;  %v974_v32 = vld [vmem:[#allocation6 + $0x58] sm:$0xff] }
 0x172   :  { %1793 = vmatpush.bf16.msra.mxu1 %v1568_v33  ;;  %v1306_v3 = vcvt.s32.f32 %v1050_v38  ;;  %v1336_v29 = vcvt.s32.f32 %v1080_v41  ;;  %v1112_v34 = vunpack.c.2.s8 %v984_v19  ;;  %v1114_v30 = vunpack.c.3.s8 %v984_v19 }
 0x173   :  { %v1600_v54 = vpack.c.bf16 %v1406_v44, %v1404_v28  ;;  %v1338_v24 = vcvt.s32.f32 %v1082_v20  ;;  %v1144_v39 = vunpack.c.2.s8 %v992_v10  ;;  %1806 = vmatpush.bf16.msra.mxu2 %v1584_v7  ;;  %v1146_v17 = vunpack.c.3.s8 %v992_v10  ;;  %v982_v28 = vld [vmem:[#allocation6 + $0x98] sm:$0xff] }
 0x174   :  { %v1550_v52 = vpack.c.bf16 %v1306_v3, %v1304_v35  ;;  %v1368_v31 = vcvt.s32.f32 %v1112_v34  ;;  %v1044_v56 = vunpack.c.0.s8 %v968_v2  ;;  %v1370_v1 = vcvt.s32.f32 %v1114_v30 }
 0x175   :  { %1819 = vmatpush.bf16.msra.mxu3 %v1600_v54  ;;  %v1566_v57 = vpack.c.bf16 %v1338_v24, %v1336_v29  ;;  %v1400_v0 = vcvt.s32.f32 %v1144_v39  ;;  %v1046_v6 = vunpack.c.1.s8 %v968_v2  ;;  %v1402_v47 = vcvt.s32.f32 %v1146_v17  ;;  %v990_v29 = vld [vmem:[#allocation6 + $0xd8] sm:$0xff] }
 0x176   :  { %1781 = vmatpush.bf16.msra.mxu0 %v1550_v52  ;;  %v1300_v46 = vcvt.s32.f32 %v1044_v56  ;;  %v1076_v63 = vunpack.c.0.s8 %v976_v25  ;;  %v1078_v50 = vunpack.c.1.s8 %v976_v25  ;;  %v1582_v60 = vpack.c.bf16 %v1370_v1, %v1368_v31 }
 0x177   :  { %1794 = vmatpush.bf16.msra.mxu1 %v1566_v57  ;;  %v1302_v55 = vcvt.s32.f32 %v1046_v6  ;;  %v1108_v37 = vunpack.c.0.s8 %v984_v19  ;;  %v1110_v45 = vunpack.c.1.s8 %v984_v19  ;;  %v1598_v23 = vpack.c.bf16 %v1402_v47, %v1400_v0 }
 0x178   :  { %v1332_v22 = vcvt.s32.f32 %v1076_v63  ;;  %v1334_v27 = vcvt.s32.f32 %v1078_v50  ;;  %v1140_v9 = vunpack.c.0.s8 %v992_v10  ;;  %1807 = vmatpush.bf16.msra.mxu2 %v1582_v60  ;;  %v1142_v40 = vunpack.c.1.s8 %v992_v10 }
 0x179   :  { %v1548_v61 = vpack.c.bf16 %v1302_v55, %v1300_v46  ;;  %v1364_v62 = vcvt.s32.f32 %v1108_v37  ;;  %v1366_v18 = vcvt.s32.f32 %v1110_v45  ;;  %1820 = vmatpush.bf16.msra.mxu3 %v1598_v23  ;;  %v861_v4 = vperm.slane %v2529_v43, 4 }
 0x17a   :  { %v1564_v2 = vpack.c.bf16 %v1334_v27, %v1332_v22  ;;  %v1396_v51 = vcvt.s32.f32 %v1140_v9  ;;  %v935_v25 = vperm.slane %v2548_v26, 4  ;;  %v1398_v8 = vcvt.s32.f32 %v1142_v40 }
 0x17b   :  { %1782 = vmatpush.bf16.msra.mxu0 %v1548_v61  ;;  %v1580_v14 = vpack.c.bf16 %v1366_v18, %v1364_v62  ;;  %v862_v48 = vperm.slane %v2529_v43, 5  ;;  %v936_v15 = vperm.slane %v2548_v26, 5  ;;  %v877_v42 = vmul.f32 %v861_v4, %v2302_v53  ;;  %v964_v61 = vld [vmem:[#allocation6 + $0x8] sm:$0xff] }
 0x17c   :  { %1795 = vmatpush.bf16.msra.mxu1 %v1564_v2  ;;  %v863_v13 = vperm.slane %v2529_v43, 6  ;;  %v937_v19 = vperm.slane %v2548_v26, 6  ;;  %v962_v33 = vmax.f32 %v2555_v5, 0.0  ;;  %v1596_v21 = vpack.c.bf16 %v1398_v8, %v1396_v51  ;;  %v972_v51 = vld [vmem:[#allocation6 + $0x48] sm:$0xff] }
 0x17d   :  { %1808 = vmatpush.bf16.msra.mxu2 %v1580_v14  ;;  %v878_v38 = vmul.f32 %v862_v48, %v2309_v59  ;;  %v1040_v41 = vunpack.c.2.s8 %v966_v12  ;;  %v1042_v10 = vunpack.c.3.s8 %v966_v12  ;;  %v951_v44 = vadd.f32 %v935_v25, %v877_v42  ;;  %v980_v8 = vld [vmem:[#allocation6 + $0x88] sm:$0xff] }
 0x17e   :  { %v879_v35 = vmul.f32 %v863_v13, %v2343_v49  ;;  %v2597_v20 = vpack.c.bf16 %v962_v33, %v962_v33  ;;  %v1072_v7 = vunpack.c.2.s8 %v974_v32  ;;  %1821 = vmatpush.bf16.msra.mxu3 %v1596_v21  ;;  %v1074_v26 = vunpack.c.3.s8 %v974_v32  ;;  %v988_v13 = vld [vmem:[#allocation6 + $0xc8] sm:$0xff] }
 0x17f   :  { %v952_v53 = vadd.f32 %v936_v15, %v878_v38  ;;  %v1296_v43 = vcvt.s32.f32 %v1040_v41  ;;  %v1298_v3 = vcvt.s32.f32 %v1042_v10  ;;  %v959_v5 = vmax.f32 %v951_v44, 0.0 }
 0x180   :  { %v953_v34 = vadd.f32 %v937_v19, %v879_v35  ;;  %1774 = vmatmul.bf16.vlgmr.msrb.gmra.mxu3 %v2597_v20  ;;  %v1328_v59 = vcvt.s32.f32 %v1072_v7  ;;  %v1104_v54 = vunpack.c.2.s8 %v982_v28  ;;  %v1330_v39 = vcvt.s32.f32 %v1074_v26 }
 0x181   :  { %v960_v24 = vmax.f32 %v952_v53, 0.0  ;;  %v1546_v30 = vpack.c.bf16 %v1298_v3, %v1296_v43  ;;  %v1106_v52 = vunpack.c.3.s8 %v982_v28  ;;  %v2600_v49 = vpack.c.bf16 %v959_v5, %v959_v5 }
 0x182   :  { %v961_v31 = vmax.f32 %v953_v34, 0.0  ;;  %v1360_v17 = vcvt.s32.f32 %v1104_v54  ;;  %v1136_v56 = vunpack.c.2.s8 %v990_v29  ;;  %v1562_v1 = vpack.c.bf16 %v1330_v39, %v1328_v59 }
 0x183   :  { %v2602_v57 = vpack.c.bf16 %v960_v24, %v960_v24  ;;  %1783 = vmatpush.bf16.msra.mxu0 %v1546_v30  ;;  %v1362_v0 = vcvt.s32.f32 %v1106_v52  ;;  %v1138_v6 = vunpack.c.3.s8 %v990_v29  ;;  %v1036_v63 = vunpack.c.0.s8 %v966_v12 }
 0x184   :  { %1735 = vmatmul.bf16.vlgmr.msrb.gmra.mxu0 %v2600_v49  ;;  %v2605_v47 = vpack.c.bf16 %v961_v31, %v961_v31  ;;  %v1392_v46 = vcvt.s32.f32 %v1136_v56  ;;  %v1038_v50 = vunpack.c.1.s8 %v966_v12  ;;  %v1068_v37 = vunpack.c.0.s8 %v974_v32  ;;  %1796 = vmatpush.bf16.msra.mxu1 %v1562_v1 }
 0x185   :  { %1748 = vmatmul.bf16.vlgmr.msrb.gmra.mxu1 %v2602_v57  ;;  %v1578_v60 = vpack.c.bf16 %v1362_v0, %v1360_v17  ;;  %v1394_v55 = vcvt.s32.f32 %v1138_v6  ;;  %v1070_v45 = vunpack.c.1.s8 %v974_v32  ;;  %v1292_v23 = vcvt.s32.f32 %v1036_v63  ;;  %v1002_v6 = vld [vmem:[#allocation6 + $0x138] sm:$0xff] }
 0x186   :  { %1761 = vmatmul.bf16.vlgmr.msrb.gmra.mxu2 %v2605_v47  ;;  %v1294_v22 = vcvt.s32.f32 %v1038_v50  ;;  %v1100_v27 = vunpack.c.0.s8 %v982_v28  ;;  %v1102_v9 = vunpack.c.1.s8 %v982_v28  ;;  %v1324_v18 = vcvt.s32.f32 %v1068_v37 }
 0x187   :  { %1809 = vmatpush.bf16.msra.mxu2 %v1578_v60  ;;  %v1594_v62 = vpack.c.bf16 %v1394_v55, %v1392_v46  ;;  %v1326_v40 = vcvt.s32.f32 %v1070_v45  ;;  %v1132_v2 = vunpack.c.0.s8 %v990_v29  ;;  %v1134_v14 = vunpack.c.1.s8 %v990_v29  ;;  %v1010_v55 = vld [vmem:[#allocation6 + $0x178] sm:$0xff] }
 0x188   :  { %v1544_v4 = vpack.c.bf16 %v1294_v22, %v1292_v23  ;;  %v1356_v25 = vcvt.s32.f32 %v1100_v27  ;;  %v1358_v12 = vcvt.s32.f32 %v1102_v9  ;;  %v1032_v32 = vunpack.c.2.s8 %v964_v61  ;;  %v1018_v27 = vld [vmem:[#allocation6 + $0x1b8] sm:$0xff] }
 0x189   :  { %1822 = vmatpush.bf16.msra.mxu3 %v1594_v62  ;;  %v1560_v48 = vpack.c.bf16 %v1326_v40, %v1324_v18  ;;  %v1388_v15 = vcvt.s32.f32 %v1132_v2  ;;  %v1034_v42 = vunpack.c.3.s8 %v964_v61  ;;  %v1390_v33 = vcvt.s32.f32 %v1134_v14  ;;  %v1026_v40 = vld [vmem:[#allocation6 + $0x1f8] sm:$0xff] }
 0x18a   :  { %1784 = vmatpush.bf16.msra.mxu0 %v1544_v4  ;;  %v1576_v19 = vpack.c.bf16 %v1358_v12, %v1356_v25  ;;  %v1064_v21 = vunpack.c.2.s8 %v972_v51  ;;  %v1066_v38 = vunpack.c.3.s8 %v972_v51  ;;  %v1288_v41 = vcvt.s32.f32 %v1032_v32 }
 0x18b   :  { %1797 = vmatpush.bf16.msra.mxu1 %v1560_v48  ;;  %v1290_v10 = vcvt.s32.f32 %v1034_v42  ;;  %v1096_v28 = vunpack.c.2.s8 %v980_v8  ;;  %v1098_v44 = vunpack.c.3.s8 %v980_v8  ;;  %v1592_v35 = vpack.c.bf16 %v1390_v33, %v1388_v15 }
 0x18c   :  { %1810 = vmatpush.bf16.msra.mxu2 %v1576_v19  ;;  %v1320_v7 = vcvt.s32.f32 %v1064_v21  ;;  %v1322_v53 = vcvt.s32.f32 %v1066_v38  ;;  %v1128_v43 = vunpack.c.2.s8 %v988_v13  ;;  %v1130_v5 = vunpack.c.3.s8 %v988_v13 }
 0x18d   :  { %v1542_v3 = vpack.c.bf16 %v1290_v10, %v1288_v41  ;;  %v1352_v26 = vcvt.s32.f32 %v1096_v28  ;;  %v1354_v29 = vcvt.s32.f32 %v1098_v44  ;;  %1823 = vmatpush.bf16.msra.mxu3 %v1592_v35  ;;  %v1028_v54 = vunpack.c.0.s8 %v964_v61 }
 0x18e   :  { %v1558_v34 = vpack.c.bf16 %v1322_v53, %v1320_v7  ;;  %v1384_v59 = vcvt.s32.f32 %v1128_v43  ;;  %v1030_v24 = vunpack.c.1.s8 %v964_v61  ;;  %v1386_v39 = vcvt.s32.f32 %v1130_v5 }
 0x18f   :  { %1785 = vmatpush.bf16.msra.mxu0 %v1542_v3  ;;  %v1574_v30 = vpack.c.bf16 %v1354_v29, %v1352_v26  ;;  %v1060_v52 = vunpack.c.0.s8 %v972_v51  ;;  %v1062_v31 = vunpack.c.1.s8 %v972_v51  ;;  %v1284_v17 = vcvt.s32.f32 %v1028_v54 }
 0x190   :  { %1798 = vmatpush.bf16.msra.mxu1 %v1558_v34  ;;  %v1286_v56 = vcvt.s32.f32 %v1030_v24  ;;  %v1092_v1 = vunpack.c.0.s8 %v980_v8  ;;  %v1094_v0 = vunpack.c.1.s8 %v980_v8  ;;  %v1590_v46 = vpack.c.bf16 %v1386_v39, %v1384_v59  ;;  %v1008_v24 = vld [vmem:[#allocation6 + $0x168] sm:$0xff] }
 0x191   :  { %1811 = vmatpush.bf16.msra.mxu2 %v1574_v30  ;;  %v1316_v63 = vcvt.s32.f32 %v1060_v52  ;;  %v1318_v50 = vcvt.s32.f32 %v1062_v31  ;;  %v1124_v60 = vunpack.c.0.s8 %v988_v13  ;;  %v1126_v22 = vunpack.c.1.s8 %v988_v13  ;;  %v1016_v31 = vld [vmem:[#allocation6 + $0x1a8] sm:$0xff] }
 0x192   :  { %v1540_v37 = vpack.c.bf16 %v1286_v56, %v1284_v17  ;;  %v1348_v45 = vcvt.s32.f32 %v1092_v1  ;;  %v1350_v23 = vcvt.s32.f32 %v1094_v0  ;;  %1824 = vmatpush.bf16.msra.mxu3 %v1590_v46  ;;  %v1184_v62 = vunpack.c.2.s8 %v1002_v6 }
 0x193   :  { %v1556_v9 = vpack.c.bf16 %v1318_v50, %v1316_v63  ;;  %v1380_v61 = vcvt.s32.f32 %v1124_v60  ;;  %v1186_v18 = vunpack.c.3.s8 %v1002_v6  ;;  %v1382_v51 = vcvt.s32.f32 %v1126_v22 }
 0x194   :  { %1786 = vmatpush.bf16.msra.mxu0 %v1540_v37  ;;  %v1572_v2 = vpack.c.bf16 %v1350_v23, %v1348_v45  ;;  %v1216_v4 = vunpack.c.2.s8 %v1010_v55  ;;  %v1218_v25 = vunpack.c.3.s8 %v1010_v55  ;;  %v1440_v12 = vcvt.s32.f32 %v1184_v62 }
 0x195   :  { %1799 = vmatpush.bf16.msra.mxu1 %v1556_v9  ;;  %v1442_v14 = vcvt.s32.f32 %v1186_v18  ;;  %v1248_v8 = vunpack.c.2.s8 %v1018_v27  ;;  %v1250_v48 = vunpack.c.3.s8 %v1018_v27  ;;  %v1588_v15 = vpack.c.bf16 %v1382_v51, %v1380_v61 }
 0x196   :  { %1812 = vmatpush.bf16.msra.mxu2 %v1572_v2  ;;  %v1472_v32 = vcvt.s32.f32 %v1216_v4  ;;  %v1474_v42 = vcvt.s32.f32 %v1218_v25  ;;  %v1280_v13 = vunpack.c.2.s8 %v1026_v40  ;;  %v1282_v38 = vunpack.c.3.s8 %v1026_v40 }
 0x197   :  { %v1618_v19 = vpack.c.bf16 %v1442_v14, %v1440_v12  ;;  %v1504_v33 = vcvt.s32.f32 %v1248_v8  ;;  %v1506_v21 = vcvt.s32.f32 %v1250_v48  ;;  %1787 = vmatmul.bf16.vlgmr.msra.gmra.mxu0 %v2573_v58  ;;  %1825 = vmatpush.bf16.msra.mxu3 %v1588_v15  ;;  %v1180_v28 = vunpack.c.0.s8 %v1002_v6  ;;  %v1000_v58 = vld [vmem:[#allocation6 + $0x128] sm:$0xff] }
 0x198   :  { %v1634_v41 = vpack.c.bf16 %v1474_v42, %v1472_v32  ;;  %v1536_v10 = vcvt.s32.f32 %v1280_v13  ;;  %1800 = vmatmul.bf16.vlgmr.msra.gmra.mxu1 %v2575_v36  ;;  %v1182_v44 = vunpack.c.1.s8 %v1002_v6  ;;  %v1538_v7 = vcvt.s32.f32 %v1282_v38  ;;  %v1024_v6 = vld [vmem:[#allocation6 + $0x1e8] sm:$0xff] }
 0x199   :  { %1831 = vmatpush.bf16.msrb.mxu0 %v1618_v19  ;;  %v1650_v35 = vpack.c.bf16 %v1506_v21, %v1504_v33  ;;  %1813 = vmatmul.bf16.vlgmr.msra.gmra.mxu2 %v2578_v11  ;;  %v1212_v53 = vunpack.c.0.s8 %v1010_v55  ;;  %v1214_v43 = vunpack.c.1.s8 %v1010_v55  ;;  %v1436_v3 = vcvt.s32.f32 %v1180_v28  ;;  %v998_v19 = vld [vmem:[#allocation6 + $0x118] sm:$0xff] }
 0x19a   :  { %1844 = vmatpush.bf16.msrb.mxu1 %v1634_v41  ;;  %v1438_v26 = vcvt.s32.f32 %v1182_v44  ;;  %v1244_v29 = vunpack.c.0.s8 %v1018_v27  ;;  %v1246_v5 = vunpack.c.1.s8 %v1018_v27  ;;  %v1666_v34 = vpack.c.bf16 %v1538_v7, %v1536_v10  ;;  %1826 = vmatmul.bf16.vlgmr.msra.gmra.mxu3 %v2580_v16  ;;  %v1006_v10 = vld [vmem:[#allocation6 + $0x158] sm:$0xff] }
 0x19b   :  { %1857 = vmatpush.bf16.msrb.mxu2 %v1650_v35  ;;  %v1468_v36 = vcvt.s32.f32 %v1212_v53  ;;  %v1470_v59 = vcvt.s32.f32 %v1214_v43  ;;  %v1276_v54 = vunpack.c.0.s8 %v1026_v40  ;;  %v1278_v11 = vunpack.c.1.s8 %v1026_v40  ;;  %v1014_v53 = vld [vmem:[#allocation6 + $0x198] sm:$0xff] }
 0x19c   :  { %v1616_v30 = vpack.c.bf16 %v1438_v26, %v1436_v3  ;;  %v1500_v39 = vcvt.s32.f32 %v1244_v29  ;;  %v1502_v52 = vcvt.s32.f32 %v1246_v5  ;;  %1870 = vmatpush.bf16.msrb.mxu3 %v1666_v34  ;;  %v1176_v1 = vunpack.c.2.s8 %v1000_v58  ;;  %v1022_v5 = vld [vmem:[#allocation6 + $0x1d8] sm:$0xff] }
 0x19d   :  { %v1632_v17 = vpack.c.bf16 %v1470_v59, %v1468_v36  ;;  %v1532_v56 = vcvt.s32.f32 %v1276_v54  ;;  %v1178_v0 = vunpack.c.3.s8 %v1000_v58  ;;  %v1534_v63 = vcvt.s32.f32 %v1278_v11 }
 0x19e   :  { %1832 = vmatpush.bf16.msrb.mxu0 %v1616_v30  ;;  %v1648_v46 = vpack.c.bf16 %v1502_v52, %v1500_v39  ;;  %v1208_v50 = vunpack.c.2.s8 %v1008_v24  ;;  %v1210_v16 = vunpack.c.3.s8 %v1008_v24  ;;  %v1432_v60 = vcvt.s32.f32 %v1176_v1 }
 0x19f   :  { %1845 = vmatpush.bf16.msrb.mxu1 %v1632_v17  ;;  %v1434_v55 = vcvt.s32.f32 %v1178_v0  ;;  %v1240_v37 = vunpack.c.2.s8 %v1016_v31  ;;  %v1242_v45 = vunpack.c.3.s8 %v1016_v31  ;;  %v1664_v23 = vpack.c.bf16 %v1534_v63, %v1532_v56 }
 0x1a0   :  { %1858 = vmatpush.bf16.msrb.mxu2 %v1648_v46  ;;  %v1464_v22 = vcvt.s32.f32 %v1208_v50  ;;  %v1466_v27 = vcvt.s32.f32 %v1210_v16  ;;  %v1272_v9 = vunpack.c.2.s8 %v1024_v6  ;;  %v1274_v40 = vunpack.c.3.s8 %v1024_v6 }
 0x1a1   :  { %v1614_v61 = vpack.c.bf16 %v1434_v55, %v1432_v60  ;;  %v1496_v62 = vcvt.s32.f32 %v1240_v37  ;;  %v1498_v18 = vcvt.s32.f32 %v1242_v45  ;;  %1871 = vmatpush.bf16.msrb.mxu3 %v1664_v23  ;;  %v1172_v4 = vunpack.c.0.s8 %v1000_v58 }
 0x1a2   :  { %v1630_v2 = vpack.c.bf16 %v1466_v27, %v1464_v22  ;;  %v1528_v51 = vcvt.s32.f32 %v1272_v9  ;;  %v1174_v25 = vunpack.c.1.s8 %v1000_v58  ;;  %v1530_v14 = vcvt.s32.f32 %v1274_v40 }
 0x1a3   :  { %1833 = vmatpush.bf16.msrb.mxu0 %v1614_v61  ;;  %v1646_v12 = vpack.c.bf16 %v1498_v18, %v1496_v62  ;;  %v1204_v8 = vunpack.c.0.s8 %v1008_v24  ;;  %v1206_v48 = vunpack.c.1.s8 %v1008_v24  ;;  %v1428_v15 = vcvt.s32.f32 %v1172_v4  ;;  %v996_v61 = vld [vmem:[#allocation6 + $0x108] sm:$0xff] }
 0x1a4   :  { %1846 = vmatpush.bf16.msrb.mxu1 %v1630_v2  ;;  %v1430_v32 = vcvt.s32.f32 %v1174_v25  ;;  %v1236_v42 = vunpack.c.0.s8 %v1016_v31  ;;  %v1238_v13 = vunpack.c.1.s8 %v1016_v31  ;;  %v1662_v33 = vpack.c.bf16 %v1530_v14, %v1528_v51  ;;  %v1004_v51 = vld [vmem:[#allocation6 + $0x148] sm:$0xff] }
 0x1a5   :  { %1859 = vmatpush.bf16.msrb.mxu2 %v1646_v12  ;;  %v1460_v21 = vcvt.s32.f32 %v1204_v8  ;;  %v1462_v38 = vcvt.s32.f32 %v1206_v48  ;;  %v1268_v41 = vunpack.c.0.s8 %v1024_v6  ;;  %v1270_v7 = vunpack.c.1.s8 %v1024_v6  ;;  %v1012_v8 = vld [vmem:[#allocation6 + $0x188] sm:$0xff] }
 0x1a6   :  { %v1612_v28 = vpack.c.bf16 %v1430_v32, %v1428_v15  ;;  %v1492_v44 = vcvt.s32.f32 %v1236_v42  ;;  %v1494_v35 = vcvt.s32.f32 %v1238_v13  ;;  %1872 = vmatpush.bf16.msrb.mxu3 %v1662_v33  ;;  %v1168_v26 = vunpack.c.2.s8 %v998_v19  ;;  %v1020_v13 = vld [vmem:[#allocation6 + $0x1c8] sm:$0xff] }
 0x1a7   :  { %v1628_v43 = vpack.c.bf16 %v1462_v38, %v1460_v21  ;;  %v1524_v3 = vcvt.s32.f32 %v1268_v41  ;;  %v1170_v29 = vunpack.c.3.s8 %v998_v19  ;;  %v1526_v34 = vcvt.s32.f32 %v1270_v7 }
 0x1a8   :  { %1834 = vmatpush.bf16.msrb.mxu0 %v1612_v28  ;;  %v1644_v58 = vpack.c.bf16 %v1494_v35, %v1492_v44  ;;  %v1200_v36 = vunpack.c.2.s8 %v1006_v10  ;;  %v1202_v59 = vunpack.c.3.s8 %v1006_v10  ;;  %v1424_v54 = vcvt.s32.f32 %v1168_v26 }
 0x1a9   :  { %1847 = vmatpush.bf16.msrb.mxu1 %v1628_v43  ;;  %v1426_v24 = vcvt.s32.f32 %v1170_v29  ;;  %v1232_v30 = vunpack.c.2.s8 %v1014_v53  ;;  %v1234_v39 = vunpack.c.3.s8 %v1014_v53  ;;  %v1660_v52 = vpack.c.bf16 %v1526_v34, %v1524_v3 }
 0x1aa   :  { %1860 = vmatpush.bf16.msrb.mxu2 %v1644_v58  ;;  %v1456_v11 = vcvt.s32.f32 %v1200_v36  ;;  %v1458_v31 = vcvt.s32.f32 %v1202_v59  ;;  %v1264_v17 = vunpack.c.2.s8 %v1022_v5  ;;  %v1266_v6 = vunpack.c.3.s8 %v1022_v5 }
 0x1ab   :  { %v1610_v56 = vpack.c.bf16 %v1426_v24, %v1424_v54  ;;  %v1488_v1 = vcvt.s32.f32 %v1232_v30  ;;  %v1490_v0 = vcvt.s32.f32 %v1234_v39  ;;  %1873 = vmatpush.bf16.msrb.mxu3 %v1660_v52  ;;  %v1164_v50 = vunpack.c.0.s8 %v998_v19 }
 0x1ac   :  { %v1626_v46 = vpack.c.bf16 %v1458_v31, %v1456_v11  ;;  %v1520_v63 = vcvt.s32.f32 %v1264_v17  ;;  %v1166_v16 = vunpack.c.1.s8 %v998_v19  ;;  %v1522_v55 = vcvt.s32.f32 %v1266_v6 }
 0x1ad   :  { %1835 = vmatpush.bf16.msrb.mxu0 %v1610_v56  ;;  %v1642_v60 = vpack.c.bf16 %v1490_v0, %v1488_v1  ;;  %v1196_v37 = vunpack.c.0.s8 %v1006_v10  ;;  %v1198_v45 = vunpack.c.1.s8 %v1006_v10  ;;  %v1420_v23 = vcvt.s32.f32 %v1164_v50 }
 0x1ae   :  { %1848 = vmatpush.bf16.msrb.mxu1 %v1626_v46  ;;  %v1422_v22 = vcvt.s32.f32 %v1166_v16  ;;  %v1228_v27 = vunpack.c.0.s8 %v1014_v53  ;;  %v1230_v9 = vunpack.c.1.s8 %v1014_v53  ;;  %v1658_v62 = vpack.c.bf16 %v1522_v55, %v1520_v63 }
 0x1af   :  { %1861 = vmatpush.bf16.msrb.mxu2 %v1642_v60  ;;  %v1452_v18 = vcvt.s32.f32 %v1196_v37  ;;  %v1454_v40 = vcvt.s32.f32 %v1198_v45  ;;  %v1260_v2 = vunpack.c.0.s8 %v1022_v5  ;;  %v1262_v14 = vunpack.c.1.s8 %v1022_v5 }
 0x1b0   :  { %v1608_v4 = vpack.c.bf16 %v1422_v22, %v1420_v23  ;;  %v1484_v25 = vcvt.s32.f32 %v1228_v27  ;;  %v1486_v12 = vcvt.s32.f32 %v1230_v9  ;;  %1874 = vmatpush.bf16.msrb.mxu3 %v1658_v62  ;;  %v1160_v32 = vunpack.c.2.s8 %v996_v61 }
 0x1b1   :  { %v1624_v48 = vpack.c.bf16 %v1454_v40, %v1452_v18  ;;  %v1516_v15 = vcvt.s32.f32 %v1260_v2  ;;  %v1162_v42 = vunpack.c.3.s8 %v996_v61  ;;  %v1518_v33 = vcvt.s32.f32 %v1262_v14 }
 0x1b2   :  { %1836 = vmatpush.bf16.msrb.mxu0 %v1608_v4  ;;  %v1640_v19 = vpack.c.bf16 %v1486_v12, %v1484_v25  ;;  %v1192_v21 = vunpack.c.2.s8 %v1004_v51  ;;  %v1194_v38 = vunpack.c.3.s8 %v1004_v51  ;;  %v1416_v41 = vcvt.s32.f32 %v1160_v32 }
 0x1b3   :  { %1849 = vmatpush.bf16.msrb.mxu1 %v1624_v48  ;;  %v1418_v10 = vcvt.s32.f32 %v1162_v42  ;;  %v1224_v28 = vunpack.c.2.s8 %v1012_v8  ;;  %v1226_v44 = vunpack.c.3.s8 %v1012_v8  ;;  %v1656_v35 = vpack.c.bf16 %v1518_v33, %v1516_v15 }
 0x1b4   :  { %1862 = vmatpush.bf16.msrb.mxu2 %v1640_v19  ;;  %v1448_v7 = vcvt.s32.f32 %v1192_v21  ;;  %v1450_v53 = vcvt.s32.f32 %v1194_v38  ;;  %v1256_v43 = vunpack.c.2.s8 %v1020_v13  ;;  %v1258_v5 = vunpack.c.3.s8 %v1020_v13 }
 0x1b5   :  { %v1606_v3 = vpack.c.bf16 %v1418_v10, %v1416_v41  ;;  %v1480_v26 = vcvt.s32.f32 %v1224_v28  ;;  %v1482_v29 = vcvt.s32.f32 %v1226_v44  ;;  %1875 = vmatpush.bf16.msrb.mxu3 %v1656_v35  ;;  %v1156_v36 = vunpack.c.0.s8 %v996_v61 }
 0x1b6   :  { %v1622_v58 = vpack.c.bf16 %v1450_v53, %v1448_v7  ;;  %v1512_v34 = vcvt.s32.f32 %v1256_v43  ;;  %v1158_v59 = vunpack.c.1.s8 %v996_v61  ;;  %v1514_v24 = vcvt.s32.f32 %v1258_v5 }
 0x1b7   :  { %1837 = vmatpush.bf16.msrb.mxu0 %v1606_v3  ;;  %v1638_v54 = vpack.c.bf16 %v1482_v29, %v1480_v26  ;;  %v1188_v30 = vunpack.c.0.s8 %v1004_v51  ;;  %v1190_v39 = vunpack.c.1.s8 %v1004_v51  ;;  %v1412_v52 = vcvt.s32.f32 %v1156_v36 }
 0x1b8   :  { %1850 = vmatpush.bf16.msrb.mxu1 %v1622_v58  ;;  %v1414_v11 = vcvt.s32.f32 %v1158_v59  ;;  %v1220_v31 = vunpack.c.0.s8 %v1012_v8  ;;  %v1222_v17 = vunpack.c.1.s8 %v1012_v8  ;;  %v1654_v56 = vpack.c.bf16 %v1514_v24, %v1512_v34 }
 0x1b9   :  { %1863 = vmatpush.bf16.msrb.mxu2 %v1638_v54  ;;  %v1444_v1 = vcvt.s32.f32 %v1188_v30  ;;  %v1446_v0 = vcvt.s32.f32 %v1190_v39  ;;  %v1252_v6 = vunpack.c.0.s8 %v1020_v13  ;;  %v1254_v16 = vunpack.c.1.s8 %v1020_v13  ;;  %v2623_v30 = vld [vmem:[#allocation7 + $0x18] sm:$0x3] }
 0x1ba   :  { %v1604_v46 = vpack.c.bf16 %v1414_v11, %v1412_v52  ;;  %v1476_v63 = vcvt.s32.f32 %v1220_v31  ;;  %v1478_v50 = vcvt.s32.f32 %v1222_v17  ;;  %1876 = vmatpush.bf16.msrb.mxu3 %v1654_v56  ;;  %v1914_v31 = vperm.slane %v2623_v30, 0 }
 0x1bb   :  { %v1620_v60 = vpack.c.bf16 %v1446_v0, %v1444_v1  ;;  %v1508_v55 = vcvt.s32.f32 %v1252_v6  ;;  %v1510_v45 = vcvt.s32.f32 %v1254_v16  ;;  %v1920_v0 = vmul.f32 %v2623_v30, %v2623_v30 }
 0x1bc   :  { %1838 = vmatpush.bf16.msrb.mxu0 %v1604_v46  ;;  %v1636_v37 = vpack.c.bf16 %v1478_v50, %v1476_v63 }
 0x1bd   :  { %1851 = vmatpush.bf16.msrb.mxu1 %v1620_v60  ;;  %v1652_v23 = vpack.c.bf16 %v1510_v45, %v1508_v55  ;;  %v1922_v50 = vperm.slane %v1920_v0, 0 }
 0x1be   :  { %1864 = vmatpush.bf16.msrb.mxu2 %v1636_v37 }
 0x1bf   :  { %1839 = vmatmul.bf16.vlgmr.msrb.gmra.mxu0 %v2600_v49  ;;  %1877 = vmatpush.bf16.msrb.mxu3 %v1652_v23 }
 0x1c0   :  { %1852 = vmatmul.bf16.vlgmr.msrb.gmra.mxu1 %v2602_v57 }
 0x1c1   :  { %1865 = vmatmul.bf16.vlgmr.msrb.gmra.mxu2 %v2605_v47 }
 0x1c2   :  { %1878 = vmatmul.bf16.vlgmr.msrb.gmra.mxu3 %v2597_v20 }
 0x1e6   :  { %v1684_v22 = vpop.f32.mrf.mxu0 }
 0x1e8   :  { %v1697_v27 = vpop.f32.mrf.mxu1 }
 0x1e9   :  { %v1698_v9 = vadd.f32 %v1697_v27, %v1684_v22 }
 0x1ee   :  { %v1686_v40 = vpop.f32.mrf.mxu0 }
 0x1ef   :  { %v1710_v61 = vpop.f32.mrf.mxu2  ;;  %v1723_v62 = vpop.f32.mrf.mxu3 }
 0x1f0   :  { %v1711_v18 = vadd.f32 %v1710_v61, %v1698_v9  ;;  %v1699_v2 = vpop.f32.mrf.mxu1 }
 0x1f2   :  { %v1724_v51 = vadd.f32 %v1723_v62, %v1711_v18 }
 0x1f7   :  { %v1712_v4 = vpop.f32.mrf.mxu2  ;;  %v1725_v25 = vpop.f32.mrf.mxu3 }
 0x201   :  { %v1736_v12 = vpop.f32.mrf.mxu0 }
 0x202   :  { %v1737_v49 = vadd.f32 %v1736_v12, %v1724_v51  ;;  %v1749_v14 = vpop.f32.mrf.mxu1 }
 0x203   :  { %v1775_v8 = vpop.f32.mrf.mxu3 }
 0x204   :  { %v1750_v57 = vadd.f32 %v1749_v14, %v1737_v49 }
 0x209   :  { %v1762_v48 = vpop.f32.mrf.mxu2  ;;  %v1738_v47 = vpop.f32.mrf.mxu0 }
 0x20a   :  { %v1763_v15 = vadd.f32 %v1762_v48, %v1750_v57  ;;  %v1751_v20 = vpop.f32.mrf.mxu1 }
 0x20b   :  { %v1777_v32 = vpop.f32.mrf.mxu3 }
 0x20c   :  { %v2617_v42 = vadd.f32 %v1775_v8, %v1763_v15  ;;  %v1915_v15 = vperm.slane %v2623_v30, 1 }
 0x20e   :  { %v1883_v35 = vrot.slane %v2617_v42, 4  ;;  %v1897_v7 = vmul.f32 %v2617_v42, %v2617_v42 }
 0x210   :  { %v1884_v53 = vadd.f32 %v1883_v35, %v2617_v42  ;;  %v1899_v43 = vrot.slane %v1897_v7, 4 }
 0x211   :  { %v1764_v13 = vpop.f32.mrf.mxu2 }
 0x212   :  { %v1885_v3 = vrot.slane %v1884_v53, 2  ;;  %v1900_v26 = vadd.f32 %v1899_v43, %v1897_v7 }
 0x214   :  { %v1788_v19 = vpop.f32.mrf.mxu0  ;;  %v1886_v29 = vadd.f32 %v1885_v3, %v1884_v53  ;;  %v1901_v5 = vrot.slane %v1900_v26, 2 }
 0x215   :  { %v1801_v33 = vpop.f32.mrf.mxu1 }
 0x216   :  { %v1887_v58 = vrot.slane %v1886_v29, 1  ;;  %v1902_v34 = vadd.f32 %v1901_v5, %v1900_v26  ;;  %v1802_v36 = vadd.f32 %v1801_v33, %v1788_v19  ;;  %v1923_v19 = vperm.slane %v1920_v0, 1 }
 0x218   :  { %v1888_v54 = vadd.f32 %v1887_v58, %v1886_v29  ;;  %v1903_v24 = vrot.slane %v1902_v34, 1 }
 0x21a   :  { %v1895_v17 = vmul.f32 0.125, %v1888_v54  ;;  %v1904_v56 = vadd.f32 %v1903_v24, %v1902_v34  ;;  %v81_v24 = vld [vmem:[#allocation7 + $0x1a] sm:$0x3] }
 0x21c   :  { %v1814_v21 = vpop.f32.mrf.mxu2  ;;  %v1790_v38 = vpop.f32.mrf.mxu0  ;;  %v1911_v6 = vmul.f32 0.125, %v1904_v56  ;;  %v2628_v63 = vmul.f32 %v1914_v31, %v1895_v17 }
 0x21d   :  { %v1803_v41 = vpop.f32.mrf.mxu1  ;;  %v1827_v10 = vpop.f32.mrf.mxu3  ;;  %v1815_v59 = vadd.f32 %v1814_v21, %v1802_v36 }
 0x21e   :  { %v1926_v22 = vmul.f32 %v1922_v50, %v1911_v6  ;;  %v1928_v27 = vmul.f32 %v2628_v63, %v2628_v63  ;;  %v82_v6 = vld [vmem:[#allocation7 + $0x1c] sm:$0x3] }
 0x21f   :  { %v1828_v52 = vadd.f32 %v1827_v10, %v1815_v59 }
 0x220   :  { %v1930_v40 = vsub.f32 %v1926_v22, %v1928_v27 }
 0x222   :  { %v1932_v14 = vmax.f32 %v1930_v40, 0.0 }
 0x224   :  { %v1816_v28 = vpop.f32.mrf.mxu2  ;;  %v1934_v20 = vadd.f32 1e-05, %v1932_v14 }
 0x225   :  { %v1829_v44 = vpop.f32.mrf.mxu3 }
 0x226   :  { %2040 = vrsqrt.f32 %v1934_v20  ;;  %vm1942_vm4 = vweird.f32 %v1934_v20 }
 0x22c   :  { %v2041_v28 = vpop.eup %2040 }
 0x22d   :  { %v1937_v7 = vmul.f32 %v2041_v28, %v1934_v20  ;;  %vm1943_vm13 = vweird.f32 %v2041_v28 }
 0x22e   :  { %vm1944_vm5 = vmor %vm1942_vm4, %vm1943_vm13 }
 0x22f   :  { %v1938_v53 = vmul.f32 %v2041_v28, %v1937_v7 }
 0x231   :  { %v1939_v3 = vmul.f32 0.5, %v1938_v53 }
 0x233   :  { %v1940_v5 = vsub.f32 1.5, %v1939_v3 }
 0x235   :  { %v1941_v36 = vmul.f32 %v2041_v28, %v1940_v5 }
 0x23c   :  { %v1840_v39 = vpop.f32.mrf.mxu0 }
 0x23d   :  { %v1853_v11 = vpop.f32.mrf.mxu1  ;;  %v1841_v1 = vadd.f32 %v1840_v39, %v1828_v52  ;;  %v1945_v52 = vsel %vm1944_vm5, %v2041_v28, %v1941_v36 }
 0x23f   :  { %v1854_v46 = vadd.f32 %v1853_v11, %v1841_v1 }
 0x244   :  { %v1866_v16 = vpop.f32.mrf.mxu2  ;;  %v1842_v60 = vpop.f32.mrf.mxu0 }
 0x245   :  { %v1867_v55 = vadd.f32 %v1866_v16, %v1854_v46  ;;  %v1855_v37 = vpop.f32.mrf.mxu1  ;;  %v1879_v45 = vpop.f32.mrf.mxu3 }
 0x247   :  { %v2630_v23 = vadd.f32 %v1879_v45, %v1867_v55  ;;  %v83_v45 = vld [vmem:[#allocation7 + $0x1e] sm:$0x3] }
 0x248   :  { %v1994_v40 = vperm.slane %v83_v45, 1 }
 0x249   :  { %v1889_v9 = vrot.slane %v2630_v23, 4  ;;  %v1898_v61 = vmul.f32 %v2630_v23, %v2630_v23 }
 0x24b   :  { %v1890_v62 = vadd.f32 %v1889_v9, %v2630_v23  ;;  %v1905_v18 = vrot.slane %v1898_v61, 4 }
 0x24c   :  { %v1868_v2 = vpop.f32.mrf.mxu2 }
 0x24d   :  { %v1891_v51 = vrot.slane %v1890_v62, 2  ;;  %v1906_v4 = vadd.f32 %v1905_v18, %v1898_v61  ;;  %v1881_v25 = vpop.f32.mrf.mxu3 }
 0x24f   :  { %v1892_v12 = vadd.f32 %v1891_v51, %v1890_v62  ;;  %v1907_v49 = vrot.slane %v1906_v4, 2 }
 0x251   :  { %v1893_v8 = vrot.slane %v1892_v12, 1  ;;  %v1908_v57 = vadd.f32 %v1907_v49, %v1906_v4 }
 0x253   :  { %v1894_v48 = vadd.f32 %v1893_v8, %v1892_v12  ;;  %v1909_v47 = vrot.slane %v1908_v57, 1  ;;  %v2023_v12 = vld [vmem:[#allocation7 + $0x20] ss:$0 sm:$0xff] }
 0x255   :  { %v1896_v32 = vmul.f32 0.125, %v1894_v48  ;;  %v1910_v13 = vadd.f32 %v1909_v47, %v1908_v57 }
 0x257   :  { %v1912_v33 = vmul.f32 0.125, %v1910_v13  ;;  %v1919_v21 = vmul.f32 %v1915_v15, %v1896_v32 }
 0x259   :  { %v1927_v38 = vmul.f32 %v1923_v19, %v1912_v33  ;;  %v1929_v41 = vmul.f32 %v1919_v21, %v1919_v21 }
 0x25b   :  { %v1931_v10 = vsub.f32 %v1927_v38, %v1929_v41 }
 0x25d   :  { %v1933_v44 = vmax.f32 %v1931_v10, 0.0 }
 0x25f   :  { %v1935_v35 = vadd.f32 1e-05, %v1933_v44 }
 0x261   :  { %2042 = vrsqrt.f32 %v1935_v35  ;;  %vm1952_vm2 = vweird.f32 %v1935_v35 }
 0x267   :  { %v2043_v43 = vpop.eup %2042 }
 0x268   :  { %v1947_v26 = vmul.f32 %v2043_v43, %v1935_v35  ;;  %vm1953_vm10 = vweird.f32 %v2043_v43 }
 0x269   :  { %vm1954_vm3 = vmor %vm1952_vm2, %vm1953_vm10 }
 0x26a   :  { %v1948_v29 = vmul.f32 %v2043_v43, %v1947_v26 }
 0x26c   :  { %v1949_v58 = vmul.f32 0.5, %v1948_v29 }
 0x26e   :  { %v1950_v34 = vsub.f32 1.5, %v1949_v58 }
 0x270   :  { %v1951_v59 = vmul.f32 %v2043_v43, %v1950_v34 }
 0x272   :  { %v1955_v54 = vsel %vm1954_vm3, %v2043_v43, %v1951_v59 }
 0x273   :  { %v1958_v39 = vrot.slane %v1955_v54, 7 }
 0x275   :  { %v1959_v11 = vsel %vm839_vm11, %v1945_v52, %v1958_v39 }
 0x276   :  { %v1961_v31 = vmul.f32 %v1959_v11, %v81_v24 }
 0x278   :  { %v1971_v17 = vperm.slane %v1961_v31, 0  ;;  %v1972_v56 = vperm.slane %v1961_v31, 1  ;;  %v1962_v1 = vmul.f32 %v1961_v31, %v2623_v30  ;;  %v1993_v30 = vperm.slane %v83_v45, 0 }
 0x27a   :  { %v1976_v0 = vmul.f32 %v1972_v56, %v1919_v21  ;;  %v1975_v46 = vmul.f32 %v1971_v17, %v2628_v63  ;;  %v1964_v16 = vperm.slane %v1962_v1, 0  ;;  %v1965_v60 = vperm.slane %v1962_v1, 1 }
 0x27c   :  { %v1979_v50 = vrot.slane %v1976_v0, 7  ;;  %v1968_v22 = vmul.f32 %v1964_v16, %v2617_v42  ;;  %v1969_v27 = vmul.f32 %v1965_v60, %v2630_v23 }
 0x27e   :  { %v1980_v55 = vsel %vm839_vm11, %v1975_v46, %v1979_v50  ;;  %vm2006_vm11 = vcmask 7168  }
 0x27f   :  { %v1982_v37 = vsub.f32 %v82_v6, %v1980_v55 }
 0x281   :  { %v1984_v9 = vperm.slane %v1982_v37, 0  ;;  %v1985_v61 = vperm.slane %v1982_v37, 1 }
 0x283   :  { %v1988_v62 = vadd.f32 %v1984_v9, %v1968_v22  ;;  %v1989_v18 = vadd.f32 %v1985_v61, %v1969_v27 }
 0x285   :  { %v1990_v2 = vmax.f32 %v1988_v62, 0.0  ;;  %v1991_v51 = vmax.f32 %v1989_v18, 0.0 }
 0x287   :  { %v1997_v63 = vmul.f32 %v1993_v30, %v1990_v2  ;;  %v1998_v4 = vmul.f32 %v1994_v40, %v1991_v51 }
 0x289   :  { %v1999_v25 = vadd.f32 %v1998_v4, %v1997_v63 }
 0x28b   :  { %2000 = vadd.xlane.f32.xlu0 %v1999_v25 }
 0x2fe   :  { %v2001_v49 = vpop.xlane.xlu0 %2000 }
 0x2ff   :  { %v2005_v14 = vadd.f32 %v2023_v12, %v2001_v49 }
 0x301   :  { %2007 = vst.msk [vmem:[%s2652_s4] sm:$0xff] %vm2006_vm11, %v2005_v14 }
 0x302   :  { %2012 = vsyncpa [#allocation3], 1 }
 0x303   :  { %2013 = vsyncpa [#allocation5], 1 }
 0x304   :  { %2014 = vsyncpa [#allocation8], 1 }

</bundles_post_ra>
